<compile_context>
chip_gen: v6e
topology: v6e:2x2x1
jax: 0.10.0
libtpu: 0.0.40
codegen_flags: <defaults>
</compile_context>

<pallas_src>
import functools

import jax
import jax.numpy as jnp
from jax.experimental import pallas as pl
from jax.experimental.pallas import tpu as pltpu


_ACTS = {
    "tanh": jnp.tanh,
    "relu": lambda x: jnp.maximum(x, 0.0),
    "swish": lambda x: x * jax.nn.sigmoid(x),
    "leakyrelu": lambda x: jnp.where(x >= 0, x, 0.01 * x),
}

_MIN_TILE = 16    # bf16 sublane-packing multiple for the streamed x row tile
_LANES = 128


def _round_up(x, m):
    return (x + m - 1) // m * m


# ----------------------------------------------------------------------------
# Fused MLP kernel: chains all Linear(+bias)+activation layers and the output
# Linear for one row-tile, entirely in VMEM / vregs.
# ----------------------------------------------------------------------------
def mlp_fused_kernel(*refs, n_hidden, act_name):
    # refs = (x_ref, w_1, b_1, ..., w_nh, b_nh, w_out, b_out, o_ref)
    act = _ACTS[act_name]
    x_ref = refs[0]
    o_ref = refs[-1]
    wb = refs[1:-1]

    h = x_ref[...]                                   # (tm, input_dim) bf16 tile
    for li in range(n_hidden):
        w = wb[2 * li][...]                          # (K, Npad) bf16, VMEM-resident
        b = wb[2 * li + 1][...]                      # (1, Npad) f32
        z = jnp.dot(h, w, preferred_element_type=jnp.float32) + b   # f32 accum
        # TODO(synk): BatchNorm1d path (if_bn=True) not implemented; the default
        # module config (if_bn=False) uses Identity, which this matches.
        h = act(z).astype(jnp.bfloat16)
    w = wb[2 * n_hidden][...]                        # (Hpad, OUTpad) bf16
    b = wb[2 * n_hidden + 1][...]                    # (1, OUTpad) f32
    out = jnp.dot(h, w, preferred_element_type=jnp.float32) + b
    o_ref[...] = out.astype(o_ref.dtype)


# ----------------------------------------------------------------------------
# Wrapper: flatten input (bf16 stream), pad hidden width + output head to 128
# lanes, build BlockSpecs, launch one fused pallas_call tiled over rows only.
# ----------------------------------------------------------------------------
def feedforward_forward(x, params, *, act="tanh", tm=1024):
    if act not in _ACTS:
        raise ValueError(f"unsupported act: {act}")
    fc_ws, fc_bs = params["fc_ws"], params["fc_bs"]
    out_w, out_b = params["out_w"], params["out_b"]
    n_hidden = len(fc_ws)
    input_dim = fc_ws[0].shape[0]
    output_dim = out_w.shape[1]

    # x.view(-1, input_dim), streamed as bf16 (halves the only M-scaling HBM
    # traffic).  If x is already bf16 upstream, this cast is a no-op.
    x2 = x.reshape(-1, input_dim).astype(jnp.bfloat16)
    M = x2.shape[0]

    # Row tile: large enough to amortize per-step overhead, multiple of 16
    # (bf16 sublanes), and clamped so the grid has >=2 steps whenever M allows
    # it (keeps both v7x TensorCores busy via the "parallel" axis).
    tm = _round_up(max(int(tm), _MIN_TILE), _MIN_TILE)
    if M > 2 * _MIN_TILE:
        tm = min(tm, _round_up(pl.cdiv(M, 2), _MIN_TILE))
    elif M >= _MIN_TILE:
        tm = min(tm, _round_up(M, _MIN_TILE))
    else:
        tm = M                          # tiny batch: single full-extent block
    grid = (pl.cdiv(M, tm),)
    # NOTE: ragged last tile is safe because the computation is a strict
    # per-row map; stale rows only feed discarded output rows.

    # --- MXU/lane-aligned weight padding (zero pads are exact no-ops) --------
    ws, bs = [], []
    prev_k = input_dim                  # layer-0 K stays unpadded (matches x2)
    for w, b in zip(fc_ws, fc_bs):
        k_real, n_real = w.shape
        n_pad = _round_up(n_real, _LANES)
        w_p = jnp.zeros((prev_k, n_pad), jnp.float32).at[:k_real, :n_real].set(w)
        b_p = jnp.zeros((1, n_pad), jnp.float32).at[:, :n_real].set(b.reshape(1, -1))
        ws.append(w_p.astype(jnp.bfloat16))   # bf16 MXU operand, cast once
        bs.append(b_p)                        # bias stays f32
        prev_k = n_pad
    out_pad = _round_up(output_dim, _LANES)   # lane-dense unmasked output store
    w_p = jnp.zeros((prev_k, out_pad), jnp.float32).at[:out_w.shape[0], :output_dim].set(out_w)
    b_p = jnp.zeros((1, out_pad), jnp.float32).at[:, :output_dim].set(out_b.reshape(1, -1))
    ws.append(w_p.astype(jnp.bfloat16))
    bs.append(b_p)

    # --- BlockSpecs -----------------------------------------------------------
    in_specs = [pl.BlockSpec((tm, input_dim), lambda i: (i, 0))]
    args = [x2]
    for w, b in zip(ws, bs):
        in_specs.append(pl.BlockSpec(w.shape, lambda i: (0, 0)))   # VMEM-resident
        in_specs.append(pl.BlockSpec(b.shape, lambda i: (0, 0)))   # VMEM-resident
        args += [w, b]

    kernel = functools.partial(mlp_fused_kernel, n_hidden=n_hidden, act_name=act)
    out = pl.pallas_call(
        kernel,
        out_shape=jax.ShapeDtypeStruct((M, out_pad), jnp.float32),
        grid=grid,
        in_specs=in_specs,
        out_specs=pl.BlockSpec((tm, out_pad), lambda i: (i, 0)),
        compiler_params=pltpu.CompilerParams(
            dimension_semantics=("parallel",),
            vmem_limit_bytes=32 * 1024 * 1024,    # headroom on v5e's 16 MiB default
        ),
    )(*args)
    return out[:, :output_dim]


# ----------------------------------------------------------------------------
# Parameter init (PyTorch nn.Linear-style uniform) and a pure-JAX reference
# using the same bf16-operand / f32-accumulation numerics as the kernel.
# ----------------------------------------------------------------------------
def init_params(key, input_dim=784, output_dim=1, h_dim=400, h_layer_num=1):
    n_hidden = h_layer_num + 1
    dims = [input_dim] + [h_dim] * n_hidden
    keys = jax.random.split(key, 2 * (n_hidden + 1))
    fc_ws, fc_bs = [], []
    for i in range(n_hidden):
        bound = dims[i] ** -0.5
        fc_ws.append(jax.random.uniform(keys[2 * i], (dims[i], dims[i + 1]),
                                        jnp.float32, -bound, bound))
        fc_bs.append(jax.random.uniform(keys[2 * i + 1], (dims[i + 1],),
                                        jnp.float32, -bound, bound))
    bound = h_dim ** -0.5
    out_w = jax.random.uniform(keys[-2], (h_dim, output_dim), jnp.float32, -bound, bound)
    out_b = jax.random.uniform(keys[-1], (output_dim,), jnp.float32, -bound, bound)
    return {"fc_ws": fc_ws, "fc_bs": fc_bs, "out_w": out_w, "out_b": out_b}


def reference_forward(x, params, *, act="tanh"):
    a = _ACTS[act]
    h = x.reshape(-1, params["fc_ws"][0].shape[0]).astype(jnp.bfloat16)
    for w, b in zip(params["fc_ws"], params["fc_bs"]):
        z = jnp.dot(h, w.astype(jnp.bfloat16), preferred_element_type=jnp.float32) + b
        h = a(z).astype(jnp.bfloat16)
    return (jnp.dot(h, params["out_w"].astype(jnp.bfloat16),
                    preferred_element_type=jnp.float32) + params["out_b"])


if __name__ == "__main__":
    B, input_dim, h_dim, h_layer_num, output_dim = 16, 784, 400, 1, 1
    key = jax.random.PRNGKey(0)
    kx, kp = jax.random.split(key)
    x = jax.random.normal(kx, (B, 1, 28, 28), jnp.float32)   # view(-1, 784) -> (16, 784)
    params = init_params(kp, input_dim, output_dim, h_dim, h_layer_num)

    fwd = jax.jit(functools.partial(feedforward_forward, act="tanh"))
    out = jax.block_until_ready(fwd(x, params))
    assert out.shape == (B, output_dim), out.shape

    ref = jax.block_until_ready(reference_forward(x, params, act="tanh"))
    max_err = float(jnp.max(jnp.abs(out - ref)))
    assert max_err < 1e-3, max_err
    print("KERNEL_OK")
</pallas_src>

<mosaic_0001>
module attributes {stable_mosaic.version = 11 : i64} {
  func.func @mlp_fused_kernel(%arg0: i32, %arg1: memref<16x784xbf16, #tpu.memory_space<vmem>>, %arg2: memref<784x512xbf16, #tpu.memory_space<vmem>>, %arg3: memref<1x512xf32, #tpu.memory_space<vmem>>, %arg4: memref<512x512xbf16, #tpu.memory_space<vmem>>, %arg5: memref<1x512xf32, #tpu.memory_space<vmem>>, %arg6: memref<512x128xbf16, #tpu.memory_space<vmem>>, %arg7: memref<1x128xf32, #tpu.memory_space<vmem>>, %arg8: memref<16x128xf32, #tpu.memory_space<vmem>>) attributes {dimension_semantics = [#tpu.dimension_semantics<parallel>], iteration_bounds = array<i64: 1>, scalar_prefetch = 0 : i64, scratch_operands = 0 : i64, tpu.core_type = #tpu.core_type<tc>, window_params = [{transform_indices = @transform_0, window_bounds = array<i64: 16, 784>}, {pipeline_mode = #tpu.pipeline_mode<synchronous>, transform_indices = @transform_1, window_bounds = array<i64: 784, 512>}, {pipeline_mode = #tpu.pipeline_mode<synchronous>, transform_indices = @transform_2, window_bounds = array<i64: 1, 512>}, {pipeline_mode = #tpu.pipeline_mode<synchronous>, transform_indices = @transform_3, window_bounds = array<i64: 512, 512>}, {pipeline_mode = #tpu.pipeline_mode<synchronous>, transform_indices = @transform_4, window_bounds = array<i64: 1, 512>}, {pipeline_mode = #tpu.pipeline_mode<synchronous>, transform_indices = @transform_5, window_bounds = array<i64: 512, 128>}, {pipeline_mode = #tpu.pipeline_mode<synchronous>, transform_indices = @transform_6, window_bounds = array<i64: 1, 128>}, {transform_indices = @transform_7, window_bounds = array<i64: 16, 128>}]} {
    %c0 = arith.constant 0 : index
    %c0_0 = arith.constant 0 : index
    %0 = vector.load %arg1[%c0, %c0_0] : memref<16x784xbf16, #tpu.memory_space<vmem>>, vector<16x784xbf16>
    %c0_1 = arith.constant 0 : index
    %c0_2 = arith.constant 0 : index
    %1 = vector.load %arg2[%c0_1, %c0_2] : memref<784x512xbf16, #tpu.memory_space<vmem>>, vector<784x512xbf16>
    %c0_3 = arith.constant 0 : index
    %c0_4 = arith.constant 0 : index
    %2 = vector.load %arg3[%c0_3, %c0_4] : memref<1x512xf32, #tpu.memory_space<vmem>>, vector<1x512xf32>
    %cst = arith.constant dense<0.000000e+00> : vector<16x512xf32>
    %3 = tpu.matmul %0, %1, %cst {dimension_numbers = #tpu.dot_dimension_numbers<[1], [0], [0], [1], [0, 0, 1, 1], [], []>} : vector<16x784xbf16>, vector<784x512xbf16>, vector<16x512xf32> -> vector<16x512xf32>
    %4 = vector.broadcast %2 : vector<1x512xf32> to vector<16x512xf32>
    %5 = arith.addf %3, %4 : vector<16x512xf32>
    %6 = math.tanh %5 : vector<16x512xf32>
    %7 = arith.truncf %6 : vector<16x512xf32> to vector<16x512xbf16>
    %c0_5 = arith.constant 0 : index
    %c0_6 = arith.constant 0 : index
    %8 = vector.load %arg4[%c0_5, %c0_6] : memref<512x512xbf16, #tpu.memory_space<vmem>>, vector<512x512xbf16>
    %c0_7 = arith.constant 0 : index
    %c0_8 = arith.constant 0 : index
    %9 = vector.load %arg5[%c0_7, %c0_8] : memref<1x512xf32, #tpu.memory_space<vmem>>, vector<1x512xf32>
    %cst_9 = arith.constant dense<0.000000e+00> : vector<16x512xf32>
    %10 = tpu.matmul %7, %8, %cst_9 {dimension_numbers = #tpu.dot_dimension_numbers<[1], [0], [0], [1], [0, 0, 1, 1], [], []>} : vector<16x512xbf16>, vector<512x512xbf16>, vector<16x512xf32> -> vector<16x512xf32>
    %11 = vector.broadcast %9 : vector<1x512xf32> to vector<16x512xf32>
    %12 = arith.addf %10, %11 : vector<16x512xf32>
    %13 = math.tanh %12 : vector<16x512xf32>
    %14 = arith.truncf %13 : vector<16x512xf32> to vector<16x512xbf16>
    %c0_10 = arith.constant 0 : index
    %c0_11 = arith.constant 0 : index
    %15 = vector.load %arg6[%c0_10, %c0_11] : memref<512x128xbf16, #tpu.memory_space<vmem>>, vector<512x128xbf16>
    %c0_12 = arith.constant 0 : index
    %c0_13 = arith.constant 0 : index
    %16 = vector.load %arg7[%c0_12, %c0_13] : memref<1x128xf32, #tpu.memory_space<vmem>>, vector<1x128xf32>
    %cst_14 = arith.constant dense<0.000000e+00> : vector<16x128xf32>
    %17 = tpu.matmul %14, %15, %cst_14 {dimension_numbers = #tpu.dot_dimension_numbers<[1], [0], [0], [1], [0, 0, 1, 1], [], []>} : vector<16x512xbf16>, vector<512x128xbf16>, vector<16x128xf32> -> vector<16x128xf32>
    %18 = vector.broadcast %16 : vector<1x128xf32> to vector<16x128xf32>
    %19 = arith.addf %17, %18 : vector<16x128xf32>
    %c0_15 = arith.constant 0 : index
    %c0_16 = arith.constant 0 : index
    %20 = vector.load %arg8[%c0_15, %c0_16] : memref<16x128xf32, #tpu.memory_space<vmem>>, vector<16x128xf32>
    tpu.vector_store %arg8[%c0_15, %c0_16], %19 {strides = array<i32>} : memref<16x128xf32, #tpu.memory_space<vmem>>, vector<16x128xf32>,
    return
  }
  func.func @transform_0(%arg0: i32) -> (i32, i32) {
    %c0_i32 = arith.constant 0 : i32
    %c0_i32_0 = arith.constant 0 : i32
    return %arg0, %c0_i32 : i32, i32
  }
  func.func @transform_1(%arg0: i32) -> (i32, i32) {
    %c0_i32 = arith.constant 0 : i32
    %c0_i32_0 = arith.constant 0 : i32
    %c0_i32_1 = arith.constant 0 : i32
    return %c0_i32, %c0_i32_0 : i32, i32
  }
  func.func @transform_2(%arg0: i32) -> (i32, i32) {
    %c0_i32 = arith.constant 0 : i32
    %c0_i32_0 = arith.constant 0 : i32
    %c0_i32_1 = arith.constant 0 : i32
    return %c0_i32, %c0_i32_0 : i32, i32
  }
  func.func @transform_3(%arg0: i32) -> (i32, i32) {
    %c0_i32 = arith.constant 0 : i32
    %c0_i32_0 = arith.constant 0 : i32
    %c0_i32_1 = arith.constant 0 : i32
    return %c0_i32, %c0_i32_0 : i32, i32
  }
  func.func @transform_4(%arg0: i32) -> (i32, i32) {
    %c0_i32 = arith.constant 0 : i32
    %c0_i32_0 = arith.constant 0 : i32
    %c0_i32_1 = arith.constant 0 : i32
    return %c0_i32, %c0_i32_0 : i32, i32
  }
  func.func @transform_5(%arg0: i32) -> (i32, i32) {
    %c0_i32 = arith.constant 0 : i32
    %c0_i32_0 = arith.constant 0 : i32
    %c0_i32_1 = arith.constant 0 : i32
    return %c0_i32, %c0_i32_0 : i32, i32
  }
  func.func @transform_6(%arg0: i32) -> (i32, i32) {
    %c0_i32 = arith.constant 0 : i32
    %c0_i32_0 = arith.constant 0 : i32
    %c0_i32_1 = arith.constant 0 : i32
    return %c0_i32, %c0_i32_0 : i32, i32
  }
  func.func @transform_7(%arg0: i32) -> (i32, i32) {
    %c0_i32 = arith.constant 0 : i32
    %c0_i32_0 = arith.constant 0 : i32
    return %arg0, %c0_i32 : i32, i32
  }
}

</mosaic_0001>

<bundles_post_ra>
// kernel: feedforward_forward.1
= control target key start
LH: loop header
LB: loop body
LE: loop exit
PB: predicated region body
PF: predicated region fallthrough
CT: control target
= control target key end

     0   :  { %vm1268_vm0 = vcmask 130048   ;;  %s5137_s1 = inlined_call_operand.vmem [shape: bf16[784,512], index: 1, kind: input, shape index: {}]   ;;  %s5138_s0 = inlined_call_operand.vmem [shape: bf16[16,784], index: 0, kind: input, shape index: {}]   ;;  %s5139_s3 = inlined_call_operand.vmem [shape: bf16[512,512], index: 3, kind: input, shape index: {}]   ;;  %s5140_s2 = inlined_call_operand.vmem [shape: f32[1,512], index: 2, kind: input, shape index: {}]   ;;  %s5141_s5 = inlined_call_operand.vmem [shape: bf16[512,128], index: 5, kind: input, shape index: {}]   ;;  %s5142_s4 = inlined_call_operand.vmem [shape: f32[1,512], index: 4, kind: input, shape index: {}]   ;;  %s5143_s6 = inlined_call_operand.vmem [shape: f32[1,128], index: 6, kind: input, shape index: {}]   ;;  %s5144_s7 = inlined_call_operand.vmem [shape: f32[16,128], index: 7, kind: output, shape index: {}]  }
   0x1   :  { %v3364_v0 = vld [vmem:[%s5137_s1 + $0xe4] ss:$16 sps:$4 sm:$0xff]   ;;  %v3368_v2 = vld [vmem:[%s5137_s1 + $0xe0] ss:$16 sps:$4 sm:$0xff]   ;;  %v4124_v51 = vld [vmem:[%s5138_s0 + $0xc] ss:$28 sps:$4 sm:$0xff]  }
   0x2   :  { %v3366_v1 = vld [vmem:[%s5137_s1 + $0x2e4] ss:$16 sps:$4 sm:$0xff]   ;;  %1272 = vmatprep.subr.bf16.mxu0 %v3364_v0  ;;  %v3369_v3 = vld [vmem:[%s5137_s1 + $0x2e0] ss:$16 sps:$4 sm:$0xff]   ;;  %1347 = vmatprep.mubr.bf16.mxu1 %v4124_v51 }
   0x3   :  { %1315 = vmatprep.subr.bf16.mxu1 %v3366_v1  ;;  %v3370_v4 = vld [vmem:[%s5137_s1 + $0xc4] ss:$16 sps:$4 sm:$0xff]   ;;  %1273 = vmatpush1.bf16.msra.mxu0 %v3368_v2  ;;  %v3374_v6 = vld [vmem:[%s5137_s1 + $0xc0] ss:$16 sps:$4 sm:$0xff]  }
   0x4   :  { %1316 = vmatpush1.bf16.msra.mxu1 %v3369_v3  ;;  %v3372_v5 = vld [vmem:[%s5137_s1 + $0x2c4] ss:$16 sps:$4 sm:$0xff]   ;;  %1274 = vmatprep.subr.bf16.mxu0 %v3370_v4  ;;  %v3375_v7 = vld [vmem:[%s5137_s1 + $0x2c0] ss:$16 sps:$4 sm:$0xff]  }
   0x5   :  { %1317 = vmatprep.subr.bf16.mxu1 %v3372_v5  ;;  %v3376_v8 = vld [vmem:[%s5137_s1 + $0xa4] ss:$16 sps:$4 sm:$0xff]   ;;  %v3380_v10 = vld [vmem:[%s5137_s1 + $0xa0] ss:$16 sps:$4 sm:$0xff]  }
   0x6   :  { %v3378_v9 = vld [vmem:[%s5137_s1 + $0x2a4] ss:$16 sps:$4 sm:$0xff]   ;;  %v3381_v11 = vld [vmem:[%s5137_s1 + $0x2a0] ss:$16 sps:$4 sm:$0xff]  }
   0x7   :  { %1275 = vmatpush1.bf16.msra.mxu0 %v3374_v6  ;;  %v3382_v12 = vld [vmem:[%s5137_s1 + $0x84] ss:$16 sps:$4 sm:$0xff]   ;;  %v3386_v14 = vld [vmem:[%s5137_s1 + $0x80] ss:$16 sps:$4 sm:$0xff]  }
   0x8   :  { %1318 = vmatpush1.bf16.msra.mxu1 %v3375_v7  ;;  %1276 = vmatprep.subr.bf16.mxu0 %v3376_v8  ;;  %v3384_v13 = vld [vmem:[%s5137_s1 + $0x284] ss:$16 sps:$4 sm:$0xff]   ;;  %v3387_v15 = vld [vmem:[%s5137_s1 + $0x280] ss:$16 sps:$4 sm:$0xff]  }
   0x9   :  { %1319 = vmatprep.subr.bf16.mxu1 %v3378_v9  ;;  %v3388_v16 = vld [vmem:[%s5137_s1 + $0x64] ss:$16 sps:$4 sm:$0xff]   ;;  %v3392_v18 = vld [vmem:[%s5137_s1 + $0x60] ss:$16 sps:$4 sm:$0xff]   ;;  %v3477_v9 = vld [vmem:[%s5137_s1 + $0xec] ss:$16 sps:$4 sm:$0xff]  }
   0xa   :  { %v3390_v17 = vld [vmem:[%s5137_s1 + $0x264] ss:$16 sps:$4 sm:$0xff]   ;;  %v3393_v19 = vld [vmem:[%s5137_s1 + $0x260] ss:$16 sps:$4 sm:$0xff]  }
   0xb   :  { %1277 = vmatpush1.bf16.msra.mxu0 %v3380_v10  ;;  %v3394_v20 = vld [vmem:[%s5137_s1 + $0x44] ss:$16 sps:$4 sm:$0xff]   ;;  %v3398_v22 = vld [vmem:[%s5137_s1 + $0x40] ss:$16 sps:$4 sm:$0xff]  }
   0xc   :  { %1320 = vmatpush1.bf16.msra.mxu1 %v3381_v11  ;;  %1278 = vmatprep.subr.bf16.mxu0 %v3382_v12  ;;  %v3396_v21 = vld [vmem:[%s5137_s1 + $0x244] ss:$16 sps:$4 sm:$0xff]   ;;  %v3399_v23 = vld [vmem:[%s5137_s1 + $0x240] ss:$16 sps:$4 sm:$0xff]   ;;  %v3925_v11 = vmov 0  }
   0xd   :  { %1321 = vmatprep.subr.bf16.mxu1 %v3384_v13  ;;  %v3400_v24 = vld [vmem:[%s5137_s1 + $0x24] ss:$16 sps:$4 sm:$0xff]   ;;  %v3404_v26 = vld [vmem:[%s5137_s1 + $0x20] ss:$16 sps:$4 sm:$0xff]   ;;  %v3475_v13 = vld [vmem:[%s5137_s1 + $0xe8] ss:$16 sps:$4 sm:$0xff]  }
   0xe   :  { %v3402_v25 = vld [vmem:[%s5137_s1 + $0x224] ss:$16 sps:$4 sm:$0xff]   ;;  %v3405_v27 = vld [vmem:[%s5137_s1 + $0x220] ss:$16 sps:$4 sm:$0xff]  }
   0xf   :  { %1279 = vmatpush1.bf16.msra.mxu0 %v3386_v14  ;;  %v3406_v28 = vld [vmem:[%s5137_s1 + $0x4] ss:$16 sps:$4 sm:$0xff]   ;;  %v3410_v30 = vld [vmem:[%s5137_s1] ss:$16 sps:$4 sm:$0xff]  }
  0x10   :  { %1322 = vmatpush1.bf16.msra.mxu1 %v3387_v15  ;;  %1280 = vmatprep.subr.bf16.mxu0 %v3388_v16  ;;  %v3408_v29 = vld [vmem:[%s5137_s1 + $0x204] ss:$16 sps:$4 sm:$0xff]   ;;  %v3411_v31 = vld [vmem:[%s5137_s1 + $0x200] ss:$16 sps:$4 sm:$0xff]   ;;  %v3484_v16 = vld [vmem:[%s5137_s1 + $0xcc] ss:$16 sps:$4 sm:$0xff]  }
  0x11   :  { %1323 = vmatprep.subr.bf16.mxu1 %v3390_v17  ;;  %v3412_v32 = vld [vmem:[%s5137_s1 + $0x1e4] ss:$16 sps:$4 sm:$0xff]   ;;  %v3416_v34 = vld [vmem:[%s5137_s1 + $0x1e0] ss:$16 sps:$4 sm:$0xff]  }
  0x12   :  { %v3414_v33 = vld [vmem:[%s5137_s1 + $0x3e4] ss:$16 sps:$4 sm:$0xff]   ;;  %v3417_v35 = vld [vmem:[%s5137_s1 + $0x3e0] ss:$16 sps:$4 sm:$0xff]  }
  0x13   :  { %1281 = vmatpush1.bf16.msra.mxu0 %v3392_v18  ;;  %v3418_v36 = vld [vmem:[%s5137_s1 + $0x1c4] ss:$16 sps:$4 sm:$0xff]   ;;  %v3422_v38 = vld [vmem:[%s5137_s1 + $0x1c0] ss:$16 sps:$4 sm:$0xff]   ;;  %v3482_v18 = vld [vmem:[%s5137_s1 + $0xc8] ss:$16 sps:$4 sm:$0xff]  }
  0x14   :  { %1324 = vmatpush1.bf16.msra.mxu1 %v3393_v19  ;;  %1282 = vmatprep.subr.bf16.mxu0 %v3394_v20  ;;  %v3420_v37 = vld [vmem:[%s5137_s1 + $0x3c4] ss:$16 sps:$4 sm:$0xff]   ;;  %v3423_v39 = vld [vmem:[%s5137_s1 + $0x3c0] ss:$16 sps:$4 sm:$0xff]   ;;  %v3490_v20 = vld [vmem:[%s5137_s1 + $0xac] ss:$16 sps:$4 sm:$0xff]  }
  0x15   :  { %1325 = vmatprep.subr.bf16.mxu1 %v3396_v21  ;;  %v3424_v40 = vld [vmem:[%s5137_s1 + $0x1a4] ss:$16 sps:$4 sm:$0xff]   ;;  %v3428_v42 = vld [vmem:[%s5137_s1 + $0x1a0] ss:$16 sps:$4 sm:$0xff]  }
  0x16   :  { %v3426_v41 = vld [vmem:[%s5137_s1 + $0x3a4] ss:$16 sps:$4 sm:$0xff]   ;;  %v3429_v43 = vld [vmem:[%s5137_s1 + $0x3a0] ss:$16 sps:$4 sm:$0xff]  }
  0x17   :  { %1283 = vmatpush1.bf16.msra.mxu0 %v3398_v22  ;;  %v3430_v44 = vld [vmem:[%s5137_s1 + $0x184] ss:$16 sps:$4 sm:$0xff]   ;;  %v3434_v46 = vld [vmem:[%s5137_s1 + $0x180] ss:$16 sps:$4 sm:$0xff]   ;;  %v3488_v22 = vld [vmem:[%s5137_s1 + $0xa8] ss:$16 sps:$4 sm:$0xff]  }
  0x18   :  { %1326 = vmatpush1.bf16.msra.mxu1 %v3399_v23  ;;  %1284 = vmatprep.subr.bf16.mxu0 %v3400_v24  ;;  %v3432_v45 = vld [vmem:[%s5137_s1 + $0x384] ss:$16 sps:$4 sm:$0xff]   ;;  %v3435_v47 = vld [vmem:[%s5137_s1 + $0x380] ss:$16 sps:$4 sm:$0xff]   ;;  %v3496_v24 = vld [vmem:[%s5137_s1 + $0x8c] ss:$16 sps:$4 sm:$0xff]  }
  0x19   :  { %1327 = vmatprep.subr.bf16.mxu1 %v3402_v25  ;;  %v3436_v48 = vld [vmem:[%s5137_s1 + $0x164] ss:$16 sps:$4 sm:$0xff]   ;;  %v3440_v52 = vld [vmem:[%s5137_s1 + $0x160] ss:$16 sps:$4 sm:$0xff]  }
  0x1a   :  { %v4116_v49 = vld [vmem:[%s5138_s0 + $0x4] ss:$28 sps:$4 sm:$0xff]   ;;  %v4210_v14 = vld [vmem:[%s5138_s0 + $0x18] ss:$28 sps:$4 sm:$0xff]  }
  0x1b   :  { %1285 = vmatpush1.bf16.msra.mxu0 %v3404_v26  ;;  %v3438_v50 = vld [vmem:[%s5137_s1 + $0x364] ss:$16 sps:$4 sm:$0xff]   ;;  %1304 = vmatprep.mubr.bf16.mxu0 %v4116_v49  ;;  %v3441_v53 = vld [vmem:[%s5137_s1 + $0x360] ss:$16 sps:$4 sm:$0xff]   ;;  %v3494_v26 = vld [vmem:[%s5137_s1 + $0x88] ss:$16 sps:$4 sm:$0xff]  }
  0x1c   :  { %1328 = vmatpush1.bf16.msra.mxu1 %v3405_v27  ;;  %1286 = vmatprep.subr.bf16.mxu0 %v3406_v28  ;;  %v3442_v54 = vld [vmem:[%s5137_s1 + $0x144] ss:$16 sps:$4 sm:$0xff]   ;;  %v3446_v56 = vld [vmem:[%s5137_s1 + $0x140] ss:$16 sps:$4 sm:$0xff]   ;;  %v3502_v28 = vld [vmem:[%s5137_s1 + $0x6c] ss:$16 sps:$4 sm:$0xff]  }
  0x1d   :  { %1329 = vmatprep.subr.bf16.mxu1 %v3408_v29  ;;  %v3444_v55 = vld [vmem:[%s5137_s1 + $0x344] ss:$16 sps:$4 sm:$0xff]   ;;  %v3447_v57 = vld [vmem:[%s5137_s1 + $0x340] ss:$16 sps:$4 sm:$0xff]  }
  0x1e   :  { %v3448_v58 = vld [vmem:[%s5137_s1 + $0x124] ss:$16 sps:$4 sm:$0xff]   ;;  %v3452_v60 = vld [vmem:[%s5137_s1 + $0x120] ss:$16 sps:$4 sm:$0xff]  }
  0x1f   :  { %1287 = vmatpush1.bf16.msra.mxu0 %v3410_v30  ;;  %v3450_v59 = vld [vmem:[%s5137_s1 + $0x324] ss:$16 sps:$4 sm:$0xff]   ;;  %v3453_v61 = vld [vmem:[%s5137_s1 + $0x320] ss:$16 sps:$4 sm:$0xff]   ;;  %v3500_v30 = vld [vmem:[%s5137_s1 + $0x68] ss:$16 sps:$4 sm:$0xff]  }
  0x20   :  { %1330 = vmatpush1.bf16.msra.mxu1 %v3411_v31  ;;  %1288 = vmatprep.subr.bf16.mxu0 %v3412_v32  ;;  %v3454_v62 = vld [vmem:[%s5137_s1 + $0x104] ss:$16 sps:$4 sm:$0xff]   ;;  %v3458_v0 = vld [vmem:[%s5137_s1 + $0x100] ss:$16 sps:$4 sm:$0xff]   ;;  %v3508_v32 = vld [vmem:[%s5137_s1 + $0x4c] ss:$16 sps:$4 sm:$0xff]  }
  0x21   :  { %1331 = vmatprep.subr.bf16.mxu1 %v3414_v33  ;;  %v3456_v63 = vld [vmem:[%s5137_s1 + $0x304] ss:$16 sps:$4 sm:$0xff]   ;;  %v3459_v1 = vld [vmem:[%s5137_s1 + $0x300] ss:$16 sps:$4 sm:$0xff]  }
  0x22   :  { %v3468_v2 = vld [vmem:[%s5137_s1 + $0x4e4] ss:$16 sps:$4 sm:$0xff]   ;;  %v4179_v4 = vld [vmem:[%s5138_s0] ss:$28 sps:$4 sm:$0xff]  }
  0x23   :  { %1289 = vmatpush2.bf16.msra.mxu0 %v3416_v34  ;;  %v3471_v3 = vld [vmem:[%s5137_s1 + $0x604] ss:$16 sps:$4 sm:$0xff]   ;;  %v3466_v6 = vld [vmem:[%s5137_s1 + $0x4e0] ss:$16 sps:$4 sm:$0xff]  }
  0x24   :  { %1332 = vmatpush2.bf16.msra.mxu1 %v3417_v35  ;;  %1290 = vmatprep.subr.bf16.mxu0 %v3418_v36  ;;  %v3463_v5 = vld [vmem:[%s5138_s0 + $0x8] ss:$28 sps:$4 sm:$0xff]   ;;  %v3469_v7 = vld [vmem:[%s5137_s1 + $0x600] ss:$16 sps:$4 sm:$0xff]  }
  0x25   :  { %1333 = vmatprep.subr.bf16.mxu1 %v3420_v37  ;;  %v3474_v8 = vld [vmem:[%s5137_s1 + $0x4c4] ss:$16 sps:$4 sm:$0xff]   ;;  %v3472_v10 = vld [vmem:[%s5137_s1 + $0x4c0] ss:$16 sps:$4 sm:$0xff]   ;;  %v3506_v35 = vld [vmem:[%s5137_s1 + $0x48] ss:$16 sps:$4 sm:$0xff]  }
  0x26   :  { %v3480_v12 = vld [vmem:[%s5137_s1 + $0x4a4] ss:$16 sps:$4 sm:$0xff]   ;;  %v3478_v15 = vld [vmem:[%s5137_s1 + $0x4a0] ss:$16 sps:$4 sm:$0xff]   ;;  %v3514_v37 = vld [vmem:[%s5137_s1 + $0x2c] ss:$16 sps:$4 sm:$0xff]  }
  0x27   :  { %1291 = vmatpush2.bf16.msra.mxu0 %v3422_v38  ;;  %v3487_v17 = vld [vmem:[%s5137_s1 + $0x484] ss:$16 sps:$4 sm:$0xff]   ;;  %v3485_v19 = vld [vmem:[%s5137_s1 + $0x480] ss:$16 sps:$4 sm:$0xff]  }
  0x28   :  { %1334 = vmatpush2.bf16.msra.mxu1 %v3423_v39  ;;  %1292 = vmatprep.subr.bf16.mxu0 %v3424_v40  ;;  %v3493_v21 = vld [vmem:[%s5137_s1 + $0x464] ss:$16 sps:$4 sm:$0xff]   ;;  %v3491_v23 = vld [vmem:[%s5137_s1 + $0x460] ss:$16 sps:$4 sm:$0xff]   ;;  %v3512_v39 = vld [vmem:[%s5137_s1 + $0x28] ss:$16 sps:$4 sm:$0xff]  }
  0x29   :  { %1335 = vmatprep.subr.bf16.mxu1 %v3426_v41  ;;  %v3499_v25 = vld [vmem:[%s5137_s1 + $0x444] ss:$16 sps:$4 sm:$0xff]   ;;  %v3497_v27 = vld [vmem:[%s5137_s1 + $0x440] ss:$16 sps:$4 sm:$0xff]   ;;  %v3520_v41 = vld [vmem:[%s5137_s1 + $0xc] ss:$16 sps:$4 sm:$0xff]  }
  0x2a   :  { %v3505_v29 = vld [vmem:[%s5137_s1 + $0x424] ss:$16 sps:$4 sm:$0xff]   ;;  %v3503_v31 = vld [vmem:[%s5137_s1 + $0x420] ss:$16 sps:$4 sm:$0xff]  }
  0x2b   :  { %1293 = vmatpush2.bf16.msra.mxu0 %v3428_v42  ;;  %v4272_v33 = vld [vmem:[%s5138_s0 + $0x14] ss:$28 sps:$4 sm:$0xff]  }
  0x2c   :  { %1336 = vmatpush2.bf16.msra.mxu1 %v3429_v43  ;;  %1294 = vmatprep.subr.bf16.mxu0 %v3430_v44  ;;  %v3511_v34 = vld [vmem:[%s5137_s1 + $0x404] ss:$16 sps:$4 sm:$0xff]   ;;  %v3509_v36 = vld [vmem:[%s5137_s1 + $0x400] ss:$16 sps:$4 sm:$0xff]   ;;  %v3518_v43 = vld [vmem:[%s5137_s1 + $0x8] ss:$16 sps:$4 sm:$0xff]  }
  0x2d   :  { %1337 = vmatprep.subr.bf16.mxu1 %v3432_v45  ;;  %v3517_v38 = vld [vmem:[%s5137_s1 + $0x5e4] ss:$16 sps:$4 sm:$0xff]   ;;  %v3515_v40 = vld [vmem:[%s5137_s1 + $0x5e0] ss:$16 sps:$4 sm:$0xff]   ;;  %v3526_v45 = vld [vmem:[%s5137_s1 + $0x1ec] ss:$16 sps:$4 sm:$0xff]  }
  0x2e   :  { %v3523_v42 = vld [vmem:[%s5137_s1 + $0x5c4] ss:$16 sps:$4 sm:$0xff]   ;;  %v3521_v44 = vld [vmem:[%s5137_s1 + $0x5c0] ss:$16 sps:$4 sm:$0xff]  }
  0x2f   :  { %1295 = vmatpush2.bf16.msra.mxu0 %v3434_v46  ;;  %v3529_v46 = vld [vmem:[%s5137_s1 + $0x5a4] ss:$16 sps:$4 sm:$0xff]  }
  0x30   :  { %1338 = vmatpush2.bf16.msra.mxu1 %v3435_v47  ;;  %1296 = vmatprep.subr.bf16.mxu0 %v3436_v48  ;;  %v3524_v47 = vld [vmem:[%s5137_s1 + $0x1e8] ss:$16 sps:$4 sm:$0xff]   ;;  %v3527_v48 = vld [vmem:[%s5137_s1 + $0x5a0] ss:$16 sps:$4 sm:$0xff]  }
  0x31   :  { %1339 = vmatprep.subr.bf16.mxu1 %v3438_v50  ;;  %v3535_v50 = vld [vmem:[%s5137_s1 + $0x584] ss:$16 sps:$4 sm:$0xff]  }
  0x33   :  { %1297 = vmatpush2.bf16.msra.mxu0 %v3440_v52  ;;  %v3530_v52 = vld [vmem:[%s5137_s1 + $0x1c8] ss:$16 sps:$4 sm:$0xff]  }
  0x34   :  { %1340 = vmatpush2.bf16.msra.mxu1 %v3441_v53  ;;  %1298 = vmatprep.subr.bf16.mxu0 %v3442_v54  ;;  %v3533_v53 = vld [vmem:[%s5137_s1 + $0x580] ss:$16 sps:$4 sm:$0xff]   ;;  %v3538_v54 = vld [vmem:[%s5137_s1 + $0x1ac] ss:$16 sps:$4 sm:$0xff]  }
  0x35   :  { %1341 = vmatprep.subr.bf16.mxu1 %v3444_v55  ;;  %v3541_v55 = vld [vmem:[%s5137_s1 + $0x564] ss:$16 sps:$4 sm:$0xff]  }
  0x37   :  { %1299 = vmatpush2.bf16.msra.mxu0 %v3446_v56  ;;  %v3536_v56 = vld [vmem:[%s5137_s1 + $0x1a8] ss:$16 sps:$4 sm:$0xff]  }
  0x38   :  { %1342 = vmatpush2.bf16.msra.mxu1 %v3447_v57  ;;  %1300 = vmatprep.subr.bf16.mxu0 %v3448_v58  ;;  %v3539_v57 = vld [vmem:[%s5137_s1 + $0x560] ss:$16 sps:$4 sm:$0xff]   ;;  %v3544_v58 = vld [vmem:[%s5137_s1 + $0x18c] ss:$16 sps:$4 sm:$0xff]  }
  0x39   :  { %1343 = vmatprep.subr.bf16.mxu1 %v3450_v59  ;;  %v3547_v59 = vld [vmem:[%s5137_s1 + $0x544] ss:$16 sps:$4 sm:$0xff]  }
  0x3b   :  { %1301 = vmatpush2.bf16.msra.mxu0 %v3452_v60  ;;  %v3542_v60 = vld [vmem:[%s5137_s1 + $0x188] ss:$16 sps:$4 sm:$0xff]  }
  0x3c   :  { %1344 = vmatpush2.bf16.msra.mxu1 %v3453_v61  ;;  %1302 = vmatprep.subr.bf16.mxu0 %v3454_v62  ;;  %v3545_v61 = vld [vmem:[%s5137_s1 + $0x540] ss:$16 sps:$4 sm:$0xff]   ;;  %v3550_v62 = vld [vmem:[%s5137_s1 + $0x16c] ss:$16 sps:$4 sm:$0xff]  }
  0x3d   :  { %1345 = vmatprep.subr.bf16.mxu1 %v3456_v63  ;;  %v3553_v63 = vld [vmem:[%s5137_s1 + $0x524] ss:$16 sps:$4 sm:$0xff]  }
  0x3f   :  { %1303 = vmatpush2.bf16.msra.mxu0 %v3458_v0  ;;  %v3548_v0 = vld [vmem:[%s5137_s1 + $0x168] ss:$16 sps:$4 sm:$0xff]  }
  0x40   :  { %1346 = vmatpush2.bf16.msra.mxu1 %v3459_v1  ;;  %1358 = vmatprep.subr.bf16.mxu0 %v3468_v2  ;;  %v3551_v1 = vld [vmem:[%s5137_s1 + $0x520] ss:$16 sps:$4 sm:$0xff]   ;;  %v3556_v2 = vld [vmem:[%s5137_s1 + $0x14c] ss:$16 sps:$4 sm:$0xff]  }
  0x41   :  { %1415 = vmatprep.subr.bf16.mxu1 %v3471_v3  ;;  %v3559_v3 = vld [vmem:[%s5137_s1 + $0x504] ss:$16 sps:$4 sm:$0xff]  }
  0x42   :  { %1305 = vmatmul.mubr.bf16.vlgmr.msra.gmra.mxu0 %v4179_v4 }
  0x43   :  { %1348 = vmatmul.mubr.bf16.vlgmr.msra.gmra.mxu1 %v3463_v5  ;;  %1359 = vmatpush1.bf16.msra.mxu0 %v3466_v6  ;;  %v3554_v5 = vld [vmem:[%s5137_s1 + $0x148] ss:$16 sps:$4 sm:$0xff]   ;;  %v3557_v6 = vld [vmem:[%s5137_s1 + $0x500] ss:$16 sps:$4 sm:$0xff]  }
  0x44   :  { %1416 = vmatpush1.bf16.msra.mxu1 %v3469_v7  ;;  %1360 = vmatprep.subr.bf16.mxu0 %v3474_v8  ;;  %v3565_v7 = vld [vmem:[%s5137_s1 + $0x12c] ss:$16 sps:$4 sm:$0xff]  }
  0x45   :  { %1433 = vmatprep.mubr.bf16.mxu1 %v3925_v11  ;;  %1444 = vmatprep.subr.bf16.mxu1 %v3477_v9  ;;  %v3568_v8 = vld [vmem:[%s5137_s1 + $0x2ec] ss:$16 sps:$4 sm:$0xff]  }
  0x46   :  { %1390 = vmatprep.mubr.bf16.mxu0 %v4272_v33  ;;  %v4389_v9 = vld [vmem:[%s5138_s0 + $0x10] ss:$28 sps:$4 sm:$0xff]  }
  0x47   :  { %1361 = vmatpush1.bf16.msra.mxu0 %v3472_v10  ;;  %v3563_v10 = vld [vmem:[%s5137_s1 + $0x128] ss:$16 sps:$4 sm:$0xff]  }
  0x48   :  { %1362 = vmatprep.subr.bf16.mxu0 %v3480_v12  ;;  %v3566_v12 = vld [vmem:[%s5137_s1 + $0x2e8] ss:$16 sps:$4 sm:$0xff]  }
  0x4b   :  { %3156 = vmatmul.mubr.msk.bf16.vlgmr.msra.gmra.mxu1 %vm1268_vm0, %v4210_v14  ;;  %1363 = vmatpush1.bf16.msra.mxu0 %v3478_v15  ;;  %v3574_v15 = vld [vmem:[%s5137_s1 + $0x2cc] ss:$16 sps:$4 sm:$0xff]  }
  0x4c   :  { %1445 = vmatpush1.bf16.msra.mxu1 %v3475_v13  ;;  %1364 = vmatprep.subr.bf16.mxu0 %v3487_v17  ;;  %v3571_v13 = vld [vmem:[%s5137_s1 + $0x10c] ss:$16 sps:$4 sm:$0xff]   ;;  %v3572_v17 = vld [vmem:[%s5137_s1 + $0x2c8] ss:$16 sps:$4 sm:$0xff]  }
  0x4d   :  { %1446 = vmatprep.subr.bf16.mxu1 %v3484_v16  ;;  %1476 = vmatprep.mubr.bf16.mxu1 %v4116_v49  ;;  %v3532_v49 = vld [vmem:[%s5137_s1 + $0x1cc] ss:$16 sps:$4 sm:$0xff]   ;;  %v3569_v16 = vld [vmem:[%s5137_s1 + $0x108] ss:$16 sps:$4 sm:$0xff]  }
  0x4f   :  { %1365 = vmatpush1.bf16.msra.mxu0 %v3485_v19  ;;  %v3580_v19 = vld [vmem:[%s5137_s1 + $0x2ac] ss:$16 sps:$4 sm:$0xff]  }
  0x50   :  { %1447 = vmatpush1.bf16.msra.mxu1 %v3482_v18  ;;  %1366 = vmatprep.subr.bf16.mxu0 %v3493_v21  ;;  %v3577_v18 = vld [vmem:[%s5137_s1 + $0x4ec] ss:$16 sps:$4 sm:$0xff]   ;;  %v3578_v21 = vld [vmem:[%s5137_s1 + $0x2a8] ss:$16 sps:$4 sm:$0xff]  }
  0x51   :  { %1448 = vmatprep.subr.bf16.mxu1 %v3490_v20  ;;  %v3575_v20 = vld [vmem:[%s5137_s1 + $0x4e8] ss:$16 sps:$4 sm:$0xff]  }
  0x53   :  { %1367 = vmatpush1.bf16.msra.mxu0 %v3491_v23  ;;  %v3581_v23 = vld [vmem:[%s5137_s1 + $0x4c8] ss:$16 sps:$4 sm:$0xff]  }
  0x54   :  { %1449 = vmatpush1.bf16.msra.mxu1 %v3488_v22  ;;  %1368 = vmatprep.subr.bf16.mxu0 %v3499_v25  ;;  %v3583_v22 = vld [vmem:[%s5137_s1 + $0x4cc] ss:$16 sps:$4 sm:$0xff]  }
  0x55   :  { %1450 = vmatprep.subr.bf16.mxu1 %v3496_v24  ;;  %v3584_v24 = vld [vmem:[%s5137_s1 + $0x288] ss:$16 sps:$4 sm:$0xff]   ;;  %v3589_v25 = vld [vmem:[%s5137_s1 + $0x4ac] ss:$16 sps:$4 sm:$0xff]  }
  0x57   :  { %1369 = vmatpush1.bf16.msra.mxu0 %v3497_v27  ;;  %v3590_v27 = vld [vmem:[%s5137_s1 + $0x268] ss:$16 sps:$4 sm:$0xff]  }
  0x58   :  { %1451 = vmatpush1.bf16.msra.mxu1 %v3494_v26  ;;  %1370 = vmatprep.subr.bf16.mxu0 %v3505_v29  ;;  %v3587_v26 = vld [vmem:[%s5137_s1 + $0x4a8] ss:$16 sps:$4 sm:$0xff]   ;;  %v3598_v29 = vld [vmem:[%s5137_s1 + $0x24c] ss:$16 sps:$4 sm:$0xff]  }
  0x59   :  { %1452 = vmatprep.subr.bf16.mxu1 %v3502_v28  ;;  %v3595_v28 = vld [vmem:[%s5137_s1 + $0x48c] ss:$16 sps:$4 sm:$0xff]  }
  0x5b   :  { %1371 = vmatpush1.bf16.msra.mxu0 %v3503_v31  ;;  %v3596_v31 = vld [vmem:[%s5137_s1 + $0x248] ss:$16 sps:$4 sm:$0xff]  }
  0x5c   :  { %1453 = vmatpush1.bf16.msra.mxu1 %v3500_v30  ;;  %1372 = vmatprep.subr.bf16.mxu0 %v3511_v34  ;;  %v3593_v30 = vld [vmem:[%s5137_s1 + $0x488] ss:$16 sps:$4 sm:$0xff]  }
  0x5d   :  { %1454 = vmatprep.subr.bf16.mxu1 %v3508_v32  ;;  %v3601_v32 = vld [vmem:[%s5137_s1 + $0x46c] ss:$16 sps:$4 sm:$0xff]   ;;  %v3599_v34 = vld [vmem:[%s5137_s1 + $0x468] ss:$16 sps:$4 sm:$0xff]  }
  0x5f   :  { %1373 = vmatpush1.bf16.msra.mxu0 %v3509_v36  ;;  %v3607_v36 = vld [vmem:[%s5137_s1 + $0x44c] ss:$16 sps:$4 sm:$0xff]  }
  0x60   :  { %1455 = vmatpush1.bf16.msra.mxu1 %v3506_v35  ;;  %1374 = vmatprep.subr.bf16.mxu0 %v3517_v38  ;;  %v3602_v35 = vld [vmem:[%s5137_s1 + $0x228] ss:$16 sps:$4 sm:$0xff]  }
  0x61   :  { %1456 = vmatprep.subr.bf16.mxu1 %v3514_v37  ;;  %v3610_v37 = vld [vmem:[%s5137_s1 + $0x20c] ss:$16 sps:$4 sm:$0xff]   ;;  %v3605_v38 = vld [vmem:[%s5137_s1 + $0x448] ss:$16 sps:$4 sm:$0xff]  }
  0x63   :  { %1375 = vmatpush2.bf16.msra.mxu0 %v3515_v40  ;;  %v3613_v40 = vld [vmem:[%s5137_s1 + $0x42c] ss:$16 sps:$4 sm:$0xff]  }
  0x64   :  { %1457 = vmatpush1.bf16.msra.mxu1 %v3512_v39  ;;  %1376 = vmatprep.subr.bf16.mxu0 %v3523_v42  ;;  %v3608_v39 = vld [vmem:[%s5137_s1 + $0x208] ss:$16 sps:$4 sm:$0xff]  }
  0x65   :  { %1458 = vmatprep.subr.bf16.mxu1 %v3520_v41  ;;  %v3616_v41 = vld [vmem:[%s5137_s1 + $0x3ec] ss:$16 sps:$4 sm:$0xff]   ;;  %v3611_v42 = vld [vmem:[%s5137_s1 + $0x428] ss:$16 sps:$4 sm:$0xff]  }
  0x67   :  { %1377 = vmatpush2.bf16.msra.mxu0 %v3521_v44  ;;  %v3619_v44 = vld [vmem:[%s5137_s1 + $0x40c] ss:$16 sps:$4 sm:$0xff]  }
  0x68   :  { %1459 = vmatpush1.bf16.msra.mxu1 %v3518_v43  ;;  %1378 = vmatprep.subr.bf16.mxu0 %v3529_v46  ;;  %v3614_v43 = vld [vmem:[%s5137_s1 + $0x3e8] ss:$16 sps:$4 sm:$0xff]  }
  0x69   :  { %1460 = vmatprep.subr.bf16.mxu1 %v3526_v45  ;;  %v3622_v45 = vld [vmem:[%s5137_s1 + $0x3cc] ss:$16 sps:$4 sm:$0xff]   ;;  %v3617_v46 = vld [vmem:[%s5137_s1 + $0x408] ss:$16 sps:$4 sm:$0xff]  }
  0x6b   :  { %1379 = vmatpush2.bf16.msra.mxu0 %v3527_v48  ;;  %v3625_v48 = vld [vmem:[%s5137_s1 + $0x5ec] ss:$16 sps:$4 sm:$0xff]  }
  0x6c   :  { %1461 = vmatpush2.bf16.msra.mxu1 %v3524_v47  ;;  %1380 = vmatprep.subr.bf16.mxu0 %v3535_v50  ;;  %v3620_v47 = vld [vmem:[%s5137_s1 + $0x3c8] ss:$16 sps:$4 sm:$0xff]  }
  0x6d   :  { %1462 = vmatprep.subr.bf16.mxu1 %v3532_v49  ;;  %v3628_v49 = vld [vmem:[%s5137_s1 + $0x3ac] ss:$16 sps:$4 sm:$0xff]   ;;  %v3623_v50 = vld [vmem:[%s5137_s1 + $0x5e8] ss:$16 sps:$4 sm:$0xff]  }
  0x6f   :  { %1381 = vmatpush2.bf16.msra.mxu0 %v3533_v53  ;;  %v3631_v53 = vld [vmem:[%s5137_s1 + $0x5cc] ss:$16 sps:$4 sm:$0xff]  }
  0x70   :  { %1463 = vmatpush2.bf16.msra.mxu1 %v3530_v52  ;;  %1382 = vmatprep.subr.bf16.mxu0 %v3541_v55  ;;  %v3626_v52 = vld [vmem:[%s5137_s1 + $0x3a8] ss:$16 sps:$4 sm:$0xff]  }
  0x71   :  { %1464 = vmatprep.subr.bf16.mxu1 %v3538_v54  ;;  %v3634_v54 = vld [vmem:[%s5137_s1 + $0x38c] ss:$16 sps:$4 sm:$0xff]   ;;  %v3629_v55 = vld [vmem:[%s5137_s1 + $0x5c8] ss:$16 sps:$4 sm:$0xff]  }
  0x73   :  { %1383 = vmatpush2.bf16.msra.mxu0 %v3539_v57  ;;  %v3637_v57 = vld [vmem:[%s5137_s1 + $0x5ac] ss:$16 sps:$4 sm:$0xff]  }
  0x74   :  { %1465 = vmatpush2.bf16.msra.mxu1 %v3536_v56  ;;  %1384 = vmatprep.subr.bf16.mxu0 %v3547_v59  ;;  %v3632_v56 = vld [vmem:[%s5137_s1 + $0x388] ss:$16 sps:$4 sm:$0xff]  }
  0x75   :  { %1466 = vmatprep.subr.bf16.mxu1 %v3544_v58  ;;  %v3640_v58 = vld [vmem:[%s5137_s1 + $0x36c] ss:$16 sps:$4 sm:$0xff]   ;;  %v3635_v59 = vld [vmem:[%s5137_s1 + $0x5a8] ss:$16 sps:$4 sm:$0xff]  }
  0x77   :  { %1385 = vmatpush2.bf16.msra.mxu0 %v3545_v61  ;;  %v3643_v61 = vld [vmem:[%s5137_s1 + $0x58c] ss:$16 sps:$4 sm:$0xff]  }
  0x78   :  { %1467 = vmatpush2.bf16.msra.mxu1 %v3542_v60  ;;  %1386 = vmatprep.subr.bf16.mxu0 %v3553_v63  ;;  %v3638_v60 = vld [vmem:[%s5137_s1 + $0x368] ss:$16 sps:$4 sm:$0xff]  }
  0x79   :  { %1468 = vmatprep.subr.bf16.mxu1 %v3550_v62  ;;  %v3646_v62 = vld [vmem:[%s5137_s1 + $0x34c] ss:$16 sps:$4 sm:$0xff]   ;;  %v3641_v63 = vld [vmem:[%s5137_s1 + $0x588] ss:$16 sps:$4 sm:$0xff]  }
  0x7b   :  { %1387 = vmatpush2.bf16.msra.mxu0 %v3551_v1  ;;  %v3649_v1 = vld [vmem:[%s5137_s1 + $0x56c] ss:$16 sps:$4 sm:$0xff]  }
  0x7c   :  { %1469 = vmatpush2.bf16.msra.mxu1 %v3548_v0  ;;  %1388 = vmatprep.subr.bf16.mxu0 %v3559_v3  ;;  %v3644_v0 = vld [vmem:[%s5137_s1 + $0x348] ss:$16 sps:$4 sm:$0xff]  }
  0x7d   :  { %1470 = vmatprep.subr.bf16.mxu1 %v3556_v2  ;;  %v3652_v2 = vld [vmem:[%s5137_s1 + $0x32c] ss:$16 sps:$4 sm:$0xff]   ;;  %v3647_v3 = vld [vmem:[%s5137_s1 + $0x568] ss:$16 sps:$4 sm:$0xff]  }
  0x7f   :  { %1389 = vmatpush2.bf16.msra.mxu0 %v3557_v6  ;;  %v3655_v6 = vld [vmem:[%s5137_s1 + $0x54c] ss:$16 sps:$4 sm:$0xff]  }
  0x80   :  { %1471 = vmatpush2.bf16.msra.mxu1 %v3554_v5  ;;  %1487 = vmatprep.subr.bf16.mxu0 %v3568_v8  ;;  %v3650_v5 = vld [vmem:[%s5137_s1 + $0x328] ss:$16 sps:$4 sm:$0xff]  }
  0x81   :  { %1472 = vmatprep.subr.bf16.mxu1 %v3565_v7  ;;  %v3658_v7 = vld [vmem:[%s5137_s1 + $0x30c] ss:$16 sps:$4 sm:$0xff]   ;;  %v3653_v8 = vld [vmem:[%s5137_s1 + $0x548] ss:$16 sps:$4 sm:$0xff]  }
  0x82   :  { %1391 = vmatmul.mubr.bf16.vlgmr.msra.gmra.mxu0 %v4389_v9 }
  0x83   :  { %1488 = vmatpush1.bf16.msra.mxu0 %v3566_v12  ;;  %1519 = vmatprep.mubr.bf16.mxu0 %v4124_v51  ;;  %v3586_v51 = vld [vmem:[%s5137_s1 + $0x28c] ss:$16 sps:$4 sm:$0xff]  }
  0x84   :  { %1473 = vmatpush2.bf16.msra.mxu1 %v3563_v10  ;;  %1489 = vmatprep.subr.bf16.mxu0 %v3574_v15  ;;  %v3656_v10 = vld [vmem:[%s5137_s1 + $0x308] ss:$16 sps:$4 sm:$0xff]   ;;  %v3661_v12 = vld [vmem:[%s5137_s1 + $0x52c] ss:$16 sps:$4 sm:$0xff]  }
  0x85   :  { %1474 = vmatprep.subr.bf16.mxu1 %v3571_v13  ;;  %v3664_v13 = vld [vmem:[%s5137_s1 + $0x60c] ss:$16 sps:$4 sm:$0xff]   ;;  %v3659_v15 = vld [vmem:[%s5137_s1 + $0x528] ss:$16 sps:$4 sm:$0xff]  }
  0x87   :  { %1490 = vmatpush1.bf16.msra.mxu0 %v3572_v17  ;;  %v3667_v17 = vld [vmem:[%s5137_s1 + $0x50c] ss:$16 sps:$4 sm:$0xff]  }
  0x88   :  { %1475 = vmatpush2.bf16.msra.mxu1 %v3569_v16  ;;  %1491 = vmatprep.subr.bf16.mxu0 %v3580_v19  ;;  %v3662_v16 = vld [vmem:[%s5137_s1 + $0x608] ss:$16 sps:$4 sm:$0xff]  }
  0x89   :  { %1530 = vmatprep.subr.bf16.mxu1 %v3577_v18  ;;  %v3670_v18 = vld [vmem:[%s5139_s3 + $0xe4] ss:$16 sps:$4 sm:$0xff]  }
  0x8a   :  { %v3924_v19 = vld [vmem:[%s5138_s0 + $0x8] ss:$28 sps:$4 sm:$0xff]  }
  0x8b   :  { %1477 = vmatmul.mubr.bf16.vlgmr.msra.gmra.mxu1 %v4179_v4  ;;  %1492 = vmatpush1.bf16.msra.mxu0 %v3578_v21  ;;  %v3592_v4 = vld [vmem:[%s5137_s1 + $0x26c] ss:$16 sps:$4 sm:$0xff]   ;;  %v3668_v21 = vld [vmem:[%s5139_s3 + $0xe0] ss:$16 sps:$4 sm:$0xff]  }
  0x8c   :  { %1531 = vmatpush1.bf16.msra.mxu1 %v3575_v20  ;;  %1493 = vmatprep.subr.bf16.mxu0 %v3586_v51  ;;  %v3665_v20 = vld [vmem:[%s5137_s1 + $0x508] ss:$16 sps:$4 sm:$0xff]   ;;  %v3676_v51 = vld [vmem:[%s5139_s3 + $0xa4] ss:$16 sps:$4 sm:$0xff]  }
  0x8d   :  { %1532 = vmatprep.subr.bf16.mxu1 %v3583_v22  ;;  %1562 = vmatprep.mubr.bf16.mxu1 %v4272_v33  ;;  %v3604_v33 = vld [vmem:[%s5137_s1 + $0x22c] ss:$16 sps:$4 sm:$0xff]   ;;  %v3673_v22 = vld [vmem:[%s5139_s3 + $0xc4] ss:$16 sps:$4 sm:$0xff]  }
  0x8f   :  { %1494 = vmatpush1.bf16.msra.mxu0 %v3584_v24  ;;  %v3682_v24 = vld [vmem:[%s5139_s3 + $0x64] ss:$16 sps:$4 sm:$0xff]  }
  0x90   :  { %1533 = vmatpush1.bf16.msra.mxu1 %v3581_v23  ;;  %1495 = vmatprep.subr.bf16.mxu0 %v3592_v4  ;;  %v3674_v23 = vld [vmem:[%s5139_s3 + $0xa0] ss:$16 sps:$4 sm:$0xff]   ;;  %v3685_v4 = vld [vmem:[%s5139_s3 + $0x44] ss:$16 sps:$4 sm:$0xff]  }
  0x91   :  { %1534 = vmatprep.subr.bf16.mxu1 %v3589_v25  ;;  %v3680_v25 = vld [vmem:[%s5139_s3 + $0x60] ss:$16 sps:$4 sm:$0xff]  }
  0x93   :  { %1496 = vmatpush1.bf16.msra.mxu0 %v3590_v27  ;;  %v3688_v27 = vld [vmem:[%s5139_s3 + $0x24] ss:$16 sps:$4 sm:$0xff]  }
  0x94   :  { %1535 = vmatpush1.bf16.msra.mxu1 %v3587_v26  ;;  %1497 = vmatprep.subr.bf16.mxu0 %v3598_v29  ;;  %v3683_v26 = vld [vmem:[%s5139_s3 + $0x40] ss:$16 sps:$4 sm:$0xff]   ;;  %v3691_v29 = vld [vmem:[%s5139_s3 + $0x4] ss:$16 sps:$4 sm:$0xff]  }
  0x95   :  { %1536 = vmatprep.subr.bf16.mxu1 %v3595_v28  ;;  %v3686_v28 = vld [vmem:[%s5139_s3 + $0x20] ss:$16 sps:$4 sm:$0xff]  }
  0x97   :  { %1498 = vmatpush1.bf16.msra.mxu0 %v3596_v31  ;;  %v3722_v31 = vld [vmem:[%s5139_s3 + $0x2e0] ss:$16 sps:$4 sm:$0xff]  }
  0x98   :  { %1537 = vmatpush1.bf16.msra.mxu1 %v3593_v30  ;;  %1499 = vmatprep.subr.bf16.mxu0 %v3604_v33  ;;  %v3689_v30 = vld [vmem:[%s5139_s3] ss:$16 sps:$4 sm:$0xff]   ;;  %v3694_v33 = vld [vmem:[%s5139_s3 + $0x1e4] ss:$16 sps:$4 sm:$0xff]  }
  0x99   :  { %1538 = vmatprep.subr.bf16.mxu1 %v3601_v32  ;;  %v3724_v32 = vld [vmem:[%s5139_s3 + $0x2e4] ss:$16 sps:$4 sm:$0xff]  }
  0x9b   :  { %1500 = vmatpush1.bf16.msra.mxu0 %v3602_v35  ;;  %v3728_v35 = vld [vmem:[%s5139_s3 + $0x2c0] ss:$16 sps:$4 sm:$0xff]  }
  0x9c   :  { %1539 = vmatpush1.bf16.msra.mxu1 %v3599_v34  ;;  %1501 = vmatprep.subr.bf16.mxu0 %v3610_v37  ;;  %v3692_v34 = vld [vmem:[%s5139_s3 + $0x1e0] ss:$16 sps:$4 sm:$0xff]   ;;  %v3697_v37 = vld [vmem:[%s5139_s3 + $0x1c4] ss:$16 sps:$4 sm:$0xff]  }
  0x9d   :  { %1540 = vmatprep.subr.bf16.mxu1 %v3607_v36  ;;  %v3730_v36 = vld [vmem:[%s5139_s3 + $0x2c4] ss:$16 sps:$4 sm:$0xff]  }
  0x9f   :  { %1502 = vmatpush1.bf16.msra.mxu0 %v3608_v39  ;;  %v3734_v39 = vld [vmem:[%s5139_s3 + $0x2a0] ss:$16 sps:$4 sm:$0xff]  }
  0xa0   :  { %1541 = vmatpush1.bf16.msra.mxu1 %v3605_v38  ;;  %1503 = vmatprep.subr.bf16.mxu0 %v3616_v41  ;;  %v3695_v38 = vld [vmem:[%s5139_s3 + $0x1c0] ss:$16 sps:$4 sm:$0xff]   ;;  %v3700_v41 = vld [vmem:[%s5139_s3 + $0x1a4] ss:$16 sps:$4 sm:$0xff]  }
  0xa1   :  { %1542 = vmatprep.subr.bf16.mxu1 %v3613_v40  ;;  %v3736_v40 = vld [vmem:[%s5139_s3 + $0x2a4] ss:$16 sps:$4 sm:$0xff]  }
  0xa3   :  { %1504 = vmatpush2.bf16.msra.mxu0 %v3614_v43  ;;  %v3740_v43 = vld [vmem:[%s5139_s3 + $0x280] ss:$16 sps:$4 sm:$0xff]  }
  0xa4   :  { %1543 = vmatpush1.bf16.msra.mxu1 %v3611_v42  ;;  %1505 = vmatprep.subr.bf16.mxu0 %v3622_v45  ;;  %v3698_v42 = vld [vmem:[%s5139_s3 + $0x1a0] ss:$16 sps:$4 sm:$0xff]   ;;  %v3703_v45 = vld [vmem:[%s5139_s3 + $0x184] ss:$16 sps:$4 sm:$0xff]  }
  0xa5   :  { %1544 = vmatprep.subr.bf16.mxu1 %v3619_v44  ;;  %v3742_v44 = vld [vmem:[%s5139_s3 + $0x284] ss:$16 sps:$4 sm:$0xff]  }
  0xa7   :  { %1506 = vmatpush2.bf16.msra.mxu0 %v3620_v47  ;;  %v3746_v47 = vld [vmem:[%s5139_s3 + $0x260] ss:$16 sps:$4 sm:$0xff]  }
  0xa8   :  { %1545 = vmatpush1.bf16.msra.mxu1 %v3617_v46  ;;  %1507 = vmatprep.subr.bf16.mxu0 %v3628_v49  ;;  %v3701_v46 = vld [vmem:[%s5139_s3 + $0x180] ss:$16 sps:$4 sm:$0xff]   ;;  %v3706_v49 = vld [vmem:[%s5139_s3 + $0x164] ss:$16 sps:$4 sm:$0xff]  }
  0xa9   :  { %1546 = vmatprep.subr.bf16.mxu1 %v3625_v48  ;;  %v3748_v48 = vld [vmem:[%s5139_s3 + $0x264] ss:$16 sps:$4 sm:$0xff]  }
  0xab   :  { %1508 = vmatpush2.bf16.msra.mxu0 %v3626_v52  ;;  %v3752_v52 = vld [vmem:[%s5139_s3 + $0x240] ss:$16 sps:$4 sm:$0xff]  }
  0xac   :  { %1547 = vmatpush2.bf16.msra.mxu1 %v3623_v50  ;;  %1509 = vmatprep.subr.bf16.mxu0 %v3634_v54  ;;  %v3704_v50 = vld [vmem:[%s5139_s3 + $0x160] ss:$16 sps:$4 sm:$0xff]   ;;  %v3709_v54 = vld [vmem:[%s5139_s3 + $0x144] ss:$16 sps:$4 sm:$0xff]  }
  0xad   :  { %1548 = vmatprep.subr.bf16.mxu1 %v3631_v53  ;;  %v3754_v53 = vld [vmem:[%s5139_s3 + $0x244] ss:$16 sps:$4 sm:$0xff]  }
  0xaf   :  { %1510 = vmatpush2.bf16.msra.mxu0 %v3632_v56  ;;  %v3758_v56 = vld [vmem:[%s5139_s3 + $0x220] ss:$16 sps:$4 sm:$0xff]  }
  0xb0   :  { %1549 = vmatpush2.bf16.msra.mxu1 %v3629_v55  ;;  %1511 = vmatprep.subr.bf16.mxu0 %v3640_v58  ;;  %v3707_v55 = vld [vmem:[%s5139_s3 + $0x140] ss:$16 sps:$4 sm:$0xff]   ;;  %v3712_v58 = vld [vmem:[%s5139_s3 + $0x124] ss:$16 sps:$4 sm:$0xff]  }
  0xb1   :  { %1550 = vmatprep.subr.bf16.mxu1 %v3637_v57  ;;  %v3760_v57 = vld [vmem:[%s5139_s3 + $0x224] ss:$16 sps:$4 sm:$0xff]  }
  0xb3   :  { %1512 = vmatpush2.bf16.msra.mxu0 %v3638_v60  ;;  %v3764_v60 = vld [vmem:[%s5139_s3 + $0x200] ss:$16 sps:$4 sm:$0xff]  }
  0xb4   :  { %1551 = vmatpush2.bf16.msra.mxu1 %v3635_v59  ;;  %1513 = vmatprep.subr.bf16.mxu0 %v3646_v62  ;;  %v3710_v59 = vld [vmem:[%s5139_s3 + $0x120] ss:$16 sps:$4 sm:$0xff]   ;;  %v3715_v62 = vld [vmem:[%s5139_s3 + $0x104] ss:$16 sps:$4 sm:$0xff]  }
  0xb5   :  { %1552 = vmatprep.subr.bf16.mxu1 %v3643_v61  ;;  %v3766_v61 = vld [vmem:[%s5139_s3 + $0x204] ss:$16 sps:$4 sm:$0xff]  }
  0xb7   :  { %1514 = vmatpush2.bf16.msra.mxu0 %v3644_v0  ;;  %v3772_v0 = vld [vmem:[%s5139_s3 + $0x3e4] ss:$16 sps:$4 sm:$0xff]  }
  0xb8   :  { %1553 = vmatpush2.bf16.msra.mxu1 %v3641_v63  ;;  %1515 = vmatprep.subr.bf16.mxu0 %v3652_v2  ;;  %v3713_v63 = vld [vmem:[%s5139_s3 + $0x100] ss:$16 sps:$4 sm:$0xff]  }
  0xb9   :  { %1554 = vmatprep.subr.bf16.mxu1 %v3649_v1  ;;  %v3718_v1 = vld [vmem:[%s5139_s3 + $0xec] ss:$16 sps:$4 sm:$0xff]   ;;  %v3770_v2 = vld [vmem:[%s5139_s3 + $0x3e0] ss:$16 sps:$4 sm:$0xff]  }
  0xbb   :  { %1516 = vmatpush2.bf16.msra.mxu0 %v3650_v5  ;;  %v3776_v5 = vld [vmem:[%s5139_s3 + $0x3c0] ss:$16 sps:$4 sm:$0xff]  }
  0xbc   :  { %1555 = vmatpush2.bf16.msra.mxu1 %v3647_v3  ;;  %1517 = vmatprep.subr.bf16.mxu0 %v3658_v7  ;;  %v3778_v3 = vld [vmem:[%s5139_s3 + $0x3c4] ss:$16 sps:$4 sm:$0xff]   ;;  %v3782_v7 = vld [vmem:[%s5139_s3 + $0x3a0] ss:$16 sps:$4 sm:$0xff]  }
  0xbd   :  { %1556 = vmatprep.subr.bf16.mxu1 %v3655_v6  ;;  %v3784_v6 = vld [vmem:[%s5139_s3 + $0x3a4] ss:$16 sps:$4 sm:$0xff]  }
  0xbf   :  { %1518 = vmatpush2.bf16.msra.mxu0 %v3656_v10  ;;  %v3788_v10 = vld [vmem:[%s5139_s3 + $0x380] ss:$16 sps:$4 sm:$0xff]  }
  0xc0   :  { %1557 = vmatpush2.bf16.msra.mxu1 %v3653_v8  ;;  %1587 = vmatprep.subr.bf16.mxu0 %v3664_v13  ;;  %v3790_v8 = vld [vmem:[%s5139_s3 + $0x384] ss:$16 sps:$4 sm:$0xff]   ;;  %v3794_v13 = vld [vmem:[%s5139_s3 + $0x360] ss:$16 sps:$4 sm:$0xff]  }
  0xc1   :  { %1558 = vmatprep.subr.bf16.mxu1 %v3661_v12  ;;  %v3796_v12 = vld [vmem:[%s5139_s3 + $0x364] ss:$16 sps:$4 sm:$0xff]  }
  0xc2   :  { %1520 = vmatmul.mubr.bf16.vlgmr.msra.gmra.mxu0 %v3924_v19  ;;  %v3809_v19 = vld [vmem:[%s5139_s3 + $0x300] ss:$16 sps:$4 sm:$0xff]  }
  0xc3   :  { %1588 = vmatpush1.bf16.msra.mxu0 %v3662_v16  ;;  %1605 = vmatprep.mubr.bf16.mxu0 %v3925_v11  ;;  %v3671_v11 = vld [vmem:[%s5139_s3 + $0xc0] ss:$16 sps:$4 sm:$0xff]   ;;  %v3802_v16 = vld [vmem:[%s5139_s3 + $0x344] ss:$16 sps:$4 sm:$0xff]  }
  0xc4   :  { %1559 = vmatpush2.bf16.msra.mxu1 %v3659_v15  ;;  %2418 = vmatprep.subr.bf16.mxu0 %v3670_v18  ;;  %v3800_v15 = vld [vmem:[%s5139_s3 + $0x340] ss:$16 sps:$4 sm:$0xff]   ;;  %v3808_v18 = vld [vmem:[%s5139_s3 + $0x324] ss:$16 sps:$4 sm:$0xff]  }
  0xc5   :  { %1560 = vmatprep.subr.bf16.mxu1 %v3667_v17  ;;  %v3806_v17 = vld [vmem:[%s5139_s3 + $0x320] ss:$16 sps:$4 sm:$0xff]  }
  0xc8   :  { %1561 = vmatpush2.bf16.msra.mxu1 %v3665_v20  ;;  %v3811_v20 = vld [vmem:[%s5139_s3 + $0x304] ss:$16 sps:$4 sm:$0xff]  }
  0xc9   :  { %2461 = vmatprep.subr.bf16.mxu1 %v3724_v32 }
  0xca   :  { %3157 = vmatmul.mubr.msk.bf16.vlgmr.msra.gmra.mxu0 %vm1268_vm0, %v4210_v14  ;;  %v3679_v14 = vld [vmem:[%s5139_s3 + $0x84] ss:$16 sps:$4 sm:$0xff]  }
  0xcb   :  { %1563 = vmatmul.mubr.bf16.vlgmr.msra.gmra.mxu1 %v4389_v9  ;;  %2419 = vmatpush1.bf16.msra.mxu0 %v3668_v21  ;;  %v3677_v9 = vld [vmem:[%s5139_s3 + $0x80] ss:$16 sps:$4 sm:$0xff]   ;;  %v3814_v21 = vld [vmem:[%s5139_s3 + $0x2ec] ss:$16 sps:$4 sm:$0xff]  }
  0xcc   :  { %2420 = vmatprep.subr.bf16.mxu0 %v3673_v22  ;;  %2462 = vmatpush1.bf16.msra.mxu1 %v3722_v31 }
  0xcd   :  { %2463 = vmatprep.subr.bf16.mxu1 %v3730_v36 }
  0xcf   :  { %2421 = vmatpush1.bf16.msra.mxu0 %v3671_v11  ;;  %v233_v11 = vlaneseq }
  0xd0   :  { %2422 = vmatprep.subr.bf16.mxu0 %v3676_v51  ;;  %2464 = vmatpush1.bf16.msra.mxu1 %v3728_v35 }
  0xd1   :  { %2465 = vmatprep.subr.bf16.mxu1 %v3736_v40 }
  0xd3   :  { %2423 = vmatpush1.bf16.msra.mxu0 %v3674_v23  ;;  %v4804_v23 = vshrl.u32 %v233_v11, 7 }
  0xd4   :  { %2424 = vmatprep.subr.bf16.mxu0 %v3679_v14  ;;  %2466 = vmatpush1.bf16.msra.mxu1 %v3734_v39 }
  0xd5   :  { %2467 = vmatprep.subr.bf16.mxu1 %v3742_v44 }
  0xd7   :  { %2425 = vmatpush1.bf16.msra.mxu0 %v3677_v9 }
  0xd8   :  { %2426 = vmatprep.subr.bf16.mxu0 %v3682_v24  ;;  %2468 = vmatpush1.bf16.msra.mxu1 %v3740_v43  ;;  %v239_v24 = vsub.s32 1, %v4804_v23 }
  0xd9   :  { %2469 = vmatprep.subr.bf16.mxu1 %v3748_v48 }
  0xdb   :  { %2427 = vmatpush1.bf16.msra.mxu0 %v3680_v25  ;;  %v235_v25 = vsub.s32 0, %v4804_v23 }
  0xdc   :  { %2428 = vmatprep.subr.bf16.mxu0 %v3685_v4  ;;  %2470 = vmatpush1.bf16.msra.mxu1 %v3746_v47 }
  0xdd   :  { %2471 = vmatprep.subr.bf16.mxu1 %v3754_v53 }
  0xdf   :  { %2429 = vmatpush1.bf16.msra.mxu0 %v3683_v26  ;;  %v4811_v26 = vld [vmem:[%s5140_s2] sm:$0xf] }
  0xe0   :  { %2430 = vmatprep.subr.bf16.mxu0 %v3688_v27  ;;  %2472 = vmatpush1.bf16.msra.mxu1 %v3752_v52 }
  0xe1   :  { %2473 = vmatprep.subr.bf16.mxu1 %v3760_v57 }
  0xe3   :  { %2431 = vmatpush1.bf16.msra.mxu0 %v3686_v28  ;;  %v240_v28 = vrot.slane %v4811_v26, %v239_v24 }
  0xe4   :  { %2432 = vmatprep.subr.bf16.mxu0 %v3691_v29  ;;  %2474 = vmatpush1.bf16.msra.mxu1 %v3758_v56  ;;  %v236_v29 = vrot.slane %v4811_v26, %v235_v25 }
  0xe5   :  { %2475 = vmatprep.subr.bf16.mxu1 %v3766_v61 }
  0xe7   :  { %2433 = vmatpush1.bf16.msra.mxu0 %v3689_v30 }
  0xe8   :  { %2434 = vmatprep.subr.bf16.mxu0 %v3694_v33  ;;  %2476 = vmatpush1.bf16.msra.mxu1 %v3764_v60 }
  0xe9   :  { %2477 = vmatprep.subr.bf16.mxu1 %v3772_v0  ;;  %v3721_v0 = vld [vmem:[%s5139_s3 + $0xcc] ss:$16 sps:$4 sm:$0xff]  }
  0xeb   :  { %2435 = vmatpush2.bf16.msra.mxu0 %v3692_v34 }
  0xec   :  { %2436 = vmatprep.subr.bf16.mxu0 %v3697_v37  ;;  %2478 = vmatpush2.bf16.msra.mxu1 %v3770_v2  ;;  %v3727_v2 = vld [vmem:[%s5139_s3 + $0xac] ss:$16 sps:$4 sm:$0xff]  }
  0xed   :  { %2479 = vmatprep.subr.bf16.mxu1 %v3778_v3  ;;  %v3725_v3 = vld [vmem:[%s5139_s3 + $0xa8] ss:$16 sps:$4 sm:$0xff]  }
  0xef   :  { %2437 = vmatpush2.bf16.msra.mxu0 %v3695_v38 }
  0xf0   :  { %2438 = vmatprep.subr.bf16.mxu0 %v3700_v41  ;;  %2480 = vmatpush2.bf16.msra.mxu1 %v3776_v5  ;;  %v3733_v5 = vld [vmem:[%s5139_s3 + $0x8c] ss:$16 sps:$4 sm:$0xff]  }
  0xf1   :  { %2481 = vmatprep.subr.bf16.mxu1 %v3784_v6  ;;  %v3731_v6 = vld [vmem:[%s5139_s3 + $0x88] ss:$16 sps:$4 sm:$0xff]  }
  0xf3   :  { %2439 = vmatpush2.bf16.msra.mxu0 %v3698_v42 }
  0xf4   :  { %2440 = vmatprep.subr.bf16.mxu0 %v3703_v45  ;;  %2482 = vmatpush2.bf16.msra.mxu1 %v3782_v7  ;;  %v3739_v7 = vld [vmem:[%s5139_s3 + $0x6c] ss:$16 sps:$4 sm:$0xff]  }
  0xf5   :  { %2483 = vmatprep.subr.bf16.mxu1 %v3790_v8  ;;  %v3737_v8 = vld [vmem:[%s5139_s3 + $0x68] ss:$16 sps:$4 sm:$0xff]  }
  0xf7   :  { %2441 = vmatpush2.bf16.msra.mxu0 %v3701_v46 }
  0xf8   :  { %2442 = vmatprep.subr.bf16.mxu0 %v3706_v49  ;;  %2484 = vmatpush2.bf16.msra.mxu1 %v3788_v10  ;;  %v3745_v10 = vld [vmem:[%s5139_s3 + $0x4c] ss:$16 sps:$4 sm:$0xff]  }
  0xf9   :  { %2485 = vmatprep.subr.bf16.mxu1 %v3796_v12  ;;  %v3743_v12 = vld [vmem:[%s5139_s3 + $0x48] ss:$16 sps:$4 sm:$0xff]  }
  0xfb   :  { %2443 = vmatpush2.bf16.msra.mxu0 %v3704_v50 }
  0xfc   :  { %2444 = vmatprep.subr.bf16.mxu0 %v3709_v54  ;;  %2486 = vmatpush2.bf16.msra.mxu1 %v3794_v13  ;;  %v3751_v13 = vld [vmem:[%s5139_s3 + $0x2c] ss:$16 sps:$4 sm:$0xff]  }
  0xfd   :  { %2487 = vmatprep.subr.bf16.mxu1 %v3802_v16  ;;  %v3757_v16 = vld [vmem:[%s5139_s3 + $0xc] ss:$16 sps:$4 sm:$0xff]  }
  0xff   :  { %2445 = vmatpush2.bf16.msra.mxu0 %v3707_v55 }
 0x100   :  { %2446 = vmatprep.subr.bf16.mxu0 %v3712_v58  ;;  %2488 = vmatpush2.bf16.msra.mxu1 %v3800_v15  ;;  %v3749_v15 = vld [vmem:[%s5139_s3 + $0x28] ss:$16 sps:$4 sm:$0xff]  }
 0x101   :  { %2489 = vmatprep.subr.bf16.mxu1 %v3808_v18  ;;  %v3763_v18 = vld [vmem:[%s5139_s3 + $0x1ec] ss:$16 sps:$4 sm:$0xff]  }
 0x102   :  { %v1306_v14 = vpop.f32.mrf.mxu0 }
 0x103   :  { %2447 = vmatpush2.bf16.msra.mxu0 %v3710_v59  ;;  %v1349_v22 = vpop.f32.mrf.mxu1  ;;  %v1307_v33 = vadd.f32 %v1306_v14, %v236_v29  ;;  %v247_v14 = vsub.s32 3, %v4804_v23 }
 0x104   :  { %2448 = vmatprep.subr.bf16.mxu0 %v3715_v62  ;;  %2490 = vmatpush2.bf16.msra.mxu1 %v3806_v17  ;;  %v1308_v4 = vpop.f32.mrf.mxu0  ;;  %v3716_v62 = vld [vmem:[%s5139_s3 + $0xe8] ss:$16 sps:$4 sm:$0xff]  }
 0x105   :  { %2491 = vmatprep.subr.bf16.mxu1 %v3811_v20  ;;  %v1351_v51 = vpop.f32.mrf.mxu1  ;;  %v1309_v32 = vadd.f32 %v1308_v4, %v240_v28  ;;  %v1350_v40 = vadd.f32 %v1349_v22, %v1307_v33  ;;  %v3755_v17 = vld [vmem:[%s5139_s3 + $0x8] ss:$16 sps:$4 sm:$0xff]  }
 0x106   :  { %v1310_v30 = vpop.f32.mrf.mxu0  ;;  %v3767_v22 = vld [vmem:[%s5139_s3 + $0x1c8] ss:$16 sps:$4 sm:$0xff]  }
 0x107   :  { %2449 = vmatpush2.bf16.msra.mxu0 %v3713_v63  ;;  %v1353_v9 = vpop.f32.mrf.mxu1  ;;  %v1311_v35 = vadd.f32 %v1310_v30, %v236_v29  ;;  %v1352_v38 = vadd.f32 %v1351_v51, %v1309_v32  ;;  %v3775_v51 = vld [vmem:[%s5139_s3 + $0x1ac] ss:$16 sps:$4 sm:$0xff]  }
 0x108   :  { %2504 = vmatprep.subr.bf16.mxu0 %v3718_v1  ;;  %2492 = vmatpush2.bf16.msra.mxu1 %v3809_v19  ;;  %v1312_v34 = vpop.f32.mrf.mxu0  ;;  %v3719_v1 = vld [vmem:[%s5139_s3 + $0xc8] ss:$16 sps:$4 sm:$0xff]   ;;  %v3781_v30 = vld [vmem:[%s5139_s3 + $0x18c] ss:$16 sps:$4 sm:$0xff]  }
 0x109   :  { %2547 = vmatprep.subr.bf16.mxu1 %v3814_v21  ;;  %v1355_v27 = vpop.f32.mrf.mxu1  ;;  %v1313_v39 = vadd.f32 %v1312_v34, %v240_v28  ;;  %v1354_v42 = vadd.f32 %v1353_v9, %v1311_v35  ;;  %v3761_v19 = vld [vmem:[%s5139_s3 + $0x1e8] ss:$16 sps:$4 sm:$0xff]   ;;  %v3769_v21 = vld [vmem:[%s5139_s3 + $0x1cc] ss:$16 sps:$4 sm:$0xff]   ;;  %v243_v9 = vsub.s32 2, %v4804_v23 }
 0x10a   :  { %v3779_v34 = vld [vmem:[%s5139_s3 + $0x188] ss:$16 sps:$4 sm:$0xff]  }
 0x10b   :  { %v1435_v31 = vpop.f32.mrf.mxu1  ;;  %v1356_v47 = vadd.f32 %v1355_v27, %v1313_v39  ;;  %v3773_v27 = vld [vmem:[%s5139_s3 + $0x1a8] ss:$16 sps:$4 sm:$0xff]   ;;  %v244_v32 = vrot.slane %v4811_v26, %v243_v9 }
 0x10d   :  { %v1437_v36 = vpop.f32.mrf.mxu1 }
 0x10f   :  { %v1439_v44 = vpop.f32.mrf.mxu1 }
 0x111   :  { %v1441_v54 = vpop.f32.mrf.mxu1 }
 0x142   :  { %v1392_v37 = vpop.f32.mrf.mxu0 }
 0x143   :  { %v1393_v45 = vadd.f32 %v1392_v37, %v1350_v40  ;;  %v3787_v37 = vld [vmem:[%s5139_s3 + $0x16c] ss:$16 sps:$4 sm:$0xff]  }
 0x144   :  { %v1394_v41 = vpop.f32.mrf.mxu0 }
 0x145   :  { %v1395_v43 = vadd.f32 %v1394_v41, %v1352_v38  ;;  %v1436_v55 = vadd.f32 %v1435_v31, %v1393_v45  ;;  %v248_v31 = vrot.slane %v4811_v26, %v247_v14  ;;  %v3785_v26 = vld [vmem:[%s5139_s3 + $0x168] ss:$16 sps:$4 sm:$0xff]  }
 0x146   :  { %v1396_v46 = vpop.f32.mrf.mxu0 }
 0x147   :  { %v1438_v48 = vadd.f32 %v1437_v36, %v1395_v43  ;;  %v1397_v49 = vadd.f32 %v1396_v46, %v1354_v42 }
 0x148   :  { %v1398_v50 = vpop.f32.mrf.mxu0 }
 0x149   :  { %v1440_v52 = vadd.f32 %v1439_v44, %v1397_v49  ;;  %v1399_v53 = vadd.f32 %v1398_v50, %v1356_v47  ;;  %3892 = vtanh.f32 %v1438_v48  ;;  %v3793_v47 = vld [vmem:[%s5139_s3 + $0x14c] ss:$16 sps:$4 sm:$0xff]  }
 0x14b   :  { %v1442_v56 = vadd.f32 %v1441_v54, %v1399_v53  ;;  %3894 = vtanh.f32 %v1440_v52  ;;  %v1478_v20 = vpop.f32.mrf.mxu1 }
 0x14c   :  { %v1479_v39 = vadd.f32 %v1478_v20, %v244_v32  ;;  %v3823_v20 = vld [vmem:[%s5139_s3 + $0x28c] ss:$16 sps:$4 sm:$0xff]  }
 0x14d   :  { %3896 = vtanh.f32 %v1442_v56  ;;  %v1480_v11 = vpop.f32.mrf.mxu1 }
 0x14e   :  { %3898 = vtanh.f32 %v1436_v55  ;;  %v1481_v38 = vadd.f32 %v1480_v11, %v248_v31  ;;  %v3824_v11 = vld [vmem:[%s5139_s3 + $0x268] ss:$16 sps:$4 sm:$0xff]  }
 0x14f   :  { %v1482_v28 = vpop.f32.mrf.mxu1 }
 0x150   :  { %v1483_v42 = vadd.f32 %v1482_v28, %v244_v32  ;;  %v3830_v28 = vld [vmem:[%s5139_s3 + $0x228] ss:$16 sps:$4 sm:$0xff]  }
 0x151   :  { %v1484_v35 = vpop.f32.mrf.mxu1  ;;  %v3836_v32 = vld [vmem:[%s5139_s3 + $0x3e8] ss:$16 sps:$4 sm:$0xff]  }
 0x152   :  { %v1485_v48 = vadd.f32 %v1484_v35, %v248_v31  ;;  %v3838_v31 = vld [vmem:[%s5139_s3 + $0x3ec] ss:$16 sps:$4 sm:$0xff]  }
 0x153   :  { %v3844_v35 = vld [vmem:[%s5139_s3 + $0x3ac] ss:$16 sps:$4 sm:$0xff]  }
 0x156   :  { %v3893_v57 = vpop.eup %3892 }
 0x158   :  { %v3895_v58 = vpop.eup %3894 }
 0x15a   :  { %v3897_v59 = vpop.eup %3896 }
 0x15b   :  { %v3899_v60 = vpop.eup %3898  ;;  %v1625_v61 = vpack.c.bf16 %v3897_v59, %v3893_v57 }
 0x15c   :  { %v4822_v63 = vpack.c.bf16 %v3895_v58, %v3899_v60  ;;  %v3791_v58 = vld [vmem:[%s5139_s3 + $0x148] ss:$16 sps:$4 sm:$0xff]  }
 0x15d   :  { %2450 = vmatprep.mubr.bf16.mxu0 %v1625_v61 }
 0x15e   :  { %2451 = vmatmul.mubr.bf16.vlgmr.msra.gmra.mxu0 %v4822_v63 }
 0x15f   :  { %2505 = vmatpush1.bf16.msra.mxu0 %v3716_v62  ;;  %2536 = vmatprep.mubr.bf16.mxu0 %v1625_v61  ;;  %v3799_v61 = vld [vmem:[%s5139_s3 + $0x12c] ss:$16 sps:$4 sm:$0xff]  }
 0x160   :  { %2506 = vmatprep.subr.bf16.mxu0 %v3721_v0 }
 0x163   :  { %2507 = vmatpush1.bf16.msra.mxu0 %v3719_v1 }
 0x164   :  { %2508 = vmatprep.subr.bf16.mxu0 %v3727_v2 }
 0x167   :  { %2509 = vmatpush1.bf16.msra.mxu0 %v3725_v3  ;;  %v3797_v3 = vld [vmem:[%s5139_s3 + $0x128] ss:$16 sps:$4 sm:$0xff]  }
 0x168   :  { %2510 = vmatprep.subr.bf16.mxu0 %v3733_v5  ;;  %v3805_v5 = vld [vmem:[%s5139_s3 + $0x10c] ss:$16 sps:$4 sm:$0xff]  }
 0x16b   :  { %2511 = vmatpush1.bf16.msra.mxu0 %v3731_v6  ;;  %v3803_v6 = vld [vmem:[%s5139_s3 + $0x108] ss:$16 sps:$4 sm:$0xff]  }
 0x16c   :  { %2512 = vmatprep.subr.bf16.mxu0 %v3739_v7 }
 0x16f   :  { %2513 = vmatpush1.bf16.msra.mxu0 %v3737_v8 }
 0x170   :  { %2514 = vmatprep.subr.bf16.mxu0 %v3745_v10 }
 0x173   :  { %2515 = vmatpush1.bf16.msra.mxu0 %v3743_v12 }
 0x174   :  { %2516 = vmatprep.subr.bf16.mxu0 %v3751_v13 }
 0x177   :  { %2517 = vmatpush1.bf16.msra.mxu0 %v3749_v15  ;;  %v3812_v15 = vld [vmem:[%s5139_s3 + $0x2e8] ss:$16 sps:$4 sm:$0xff]  }
 0x178   :  { %2518 = vmatprep.subr.bf16.mxu0 %v3757_v16 }
 0x17b   :  { %2519 = vmatpush1.bf16.msra.mxu0 %v3755_v17  ;;  %v3817_v17 = vld [vmem:[%s5139_s3 + $0x2cc] ss:$16 sps:$4 sm:$0xff]  }
 0x17c   :  { %2520 = vmatprep.subr.bf16.mxu0 %v3763_v18  ;;  %v3820_v18 = vld [vmem:[%s5139_s3 + $0x2ac] ss:$16 sps:$4 sm:$0xff]  }
 0x17f   :  { %2521 = vmatpush2.bf16.msra.mxu0 %v3761_v19  ;;  %v3818_v19 = vld [vmem:[%s5139_s3 + $0x2a8] ss:$16 sps:$4 sm:$0xff]  }
 0x180   :  { %2522 = vmatprep.subr.bf16.mxu0 %v3769_v21  ;;  %v3821_v21 = vld [vmem:[%s5139_s3 + $0x288] ss:$16 sps:$4 sm:$0xff]  }
 0x182   :  { %v1521_v4 = vpop.f32.mrf.mxu0 }
 0x183   :  { %2523 = vmatpush2.bf16.msra.mxu0 %v3767_v22  ;;  %v1522_v44 = vadd.f32 %v1521_v4, %v1479_v39  ;;  %v3826_v22 = vld [vmem:[%s5139_s3 + $0x26c] ss:$16 sps:$4 sm:$0xff]   ;;  %v3827_v4 = vld [vmem:[%s5139_s3 + $0x248] ss:$16 sps:$4 sm:$0xff]  }
 0x184   :  { %v1523_v29 = vpop.f32.mrf.mxu0  ;;  %2524 = vmatprep.subr.bf16.mxu0 %v3775_v51  ;;  %v3829_v51 = vld [vmem:[%s5139_s3 + $0x24c] ss:$16 sps:$4 sm:$0xff]  }
 0x185   :  { %v1524_v43 = vadd.f32 %v1523_v29, %v1481_v38  ;;  %v3835_v29 = vld [vmem:[%s5139_s3 + $0x20c] ss:$16 sps:$4 sm:$0xff]   ;;  %v3845_v38 = vld [vmem:[%s5139_s3 + $0x388] ss:$16 sps:$4 sm:$0xff]  }
 0x186   :  { %v1525_v33 = vpop.f32.mrf.mxu0  ;;  %v3850_v39 = vld [vmem:[%s5139_s3 + $0x36c] ss:$16 sps:$4 sm:$0xff]  }
 0x187   :  { %2525 = vmatpush2.bf16.msra.mxu0 %v3773_v27  ;;  %v1526_v49 = vadd.f32 %v1525_v33, %v1483_v42  ;;  %v3832_v27 = vld [vmem:[%s5139_s3 + $0x22c] ss:$16 sps:$4 sm:$0xff]   ;;  %v3851_v42 = vld [vmem:[%s5139_s3 + $0x348] ss:$16 sps:$4 sm:$0xff]  }
 0x188   :  { %v1527_v36 = vpop.f32.mrf.mxu0  ;;  %2526 = vmatprep.subr.bf16.mxu0 %v3781_v30  ;;  %v3833_v30 = vld [vmem:[%s5139_s3 + $0x208] ss:$16 sps:$4 sm:$0xff]   ;;  %v3841_v33 = vld [vmem:[%s5139_s3 + $0x3cc] ss:$16 sps:$4 sm:$0xff]  }
 0x189   :  { %v1528_v55 = vadd.f32 %v1527_v36, %v1485_v48  ;;  %v3842_v36 = vld [vmem:[%s5139_s3 + $0x3a8] ss:$16 sps:$4 sm:$0xff]   ;;  %v3862_v48 = vld [vmem:[%s5141_s5 + $0x70] sm:$0xff]  }
 0x18a   :  { %v1607_v41 = vpop.f32.mrf.mxu0 }
 0x18b   :  { %v1564_v40 = vpop.f32.mrf.mxu1  ;;  %2527 = vmatpush2.bf16.msra.mxu0 %v3779_v34  ;;  %v3839_v34 = vld [vmem:[%s5139_s3 + $0x3c8] ss:$16 sps:$4 sm:$0xff]  }
 0x18c   :  { %v1609_v46 = vpop.f32.mrf.mxu0  ;;  %2528 = vmatprep.subr.bf16.mxu0 %v3787_v37  ;;  %v1565_v52 = vadd.f32 %v1564_v40, %v1522_v44  ;;  %v3847_v37 = vld [vmem:[%s5139_s3 + $0x38c] ss:$16 sps:$4 sm:$0xff]   ;;  %v3848_v40 = vld [vmem:[%s5139_s3 + $0x368] ss:$16 sps:$4 sm:$0xff]  }
 0x18d   :  { %v1566_v45 = vpop.f32.mrf.mxu1  ;;  %v3859_v44 = vld [vmem:[%s5139_s3 + $0x30c] ss:$16 sps:$4 sm:$0xff]  }
 0x18e   :  { %v1567_v50 = vadd.f32 %v1566_v45, %v1524_v43  ;;  %v1611_v54 = vpop.f32.mrf.mxu0  ;;  %v1608_v1 = vadd.f32 %v1607_v41, %v1565_v52  ;;  %v3853_v41 = vld [vmem:[%s5139_s3 + $0x34c] ss:$16 sps:$4 sm:$0xff]   ;;  %v3857_v45 = vld [vmem:[%s5139_s3 + $0x308] ss:$16 sps:$4 sm:$0xff]  }
 0x18f   :  { %v1568_v53 = vpop.f32.mrf.mxu1  ;;  %2529 = vmatpush2.bf16.msra.mxu0 %v3785_v26  ;;  %v3856_v43 = vld [vmem:[%s5139_s3 + $0x32c] ss:$16 sps:$4 sm:$0xff]   ;;  %v3854_v26 = vld [vmem:[%s5139_s3 + $0x328] ss:$16 sps:$4 sm:$0xff]  }
 0x190   :  { %v1610_v56 = vadd.f32 %v1609_v46, %v1567_v50  ;;  %v1569_v57 = vadd.f32 %v1568_v53, %v1526_v49  ;;  %v1613_v60 = vpop.f32.mrf.mxu0  ;;  %2530 = vmatprep.subr.bf16.mxu0 %v3793_v47  ;;  %v3860_v46 = vld [vmem:[%s5141_s5 + $0x78] sm:$0xff]   ;;  %v3863_v49 = vld [vmem:[%s5141_s5 + $0x30] sm:$0xff]   ;;  %v3864_v50 = vld [vmem:[%s5141_s5 + $0x68] sm:$0xff]  }
 0x191   :  { %v1570_v59 = vpop.f32.mrf.mxu1  ;;  %v3861_v47 = vld [vmem:[%s5141_s5 + $0x38] sm:$0xff]   ;;  %v3865_v52 = vld [vmem:[%s5141_s5 + $0x28] sm:$0xff]   ;;  %v3866_v53 = vld [vmem:[%s5141_s5 + $0x60] sm:$0xff]  }
 0x192   :  { %v1612_v62 = vadd.f32 %v1611_v54, %v1569_v57  ;;  %v1571_v0 = vadd.f32 %v1570_v59, %v1528_v55  ;;  %3900 = vtanh.f32 %v1610_v56  ;;  %v3867_v54 = vld [vmem:[%s5141_s5 + $0x20] sm:$0xff]   ;;  %v3868_v55 = vld [vmem:[%s5141_s5 + $0x58] sm:$0xff]   ;;  %v3870_v57 = vld [vmem:[%s5141_s5 + $0x50] sm:$0xff]  }
 0x193   :  { %2531 = vmatpush2.bf16.msra.mxu0 %v3791_v58  ;;  %v3869_v56 = vld [vmem:[%s5141_s5 + $0x18] sm:$0xff]   ;;  %v3871_v58 = vld [vmem:[%s5141_s5 + $0x10] sm:$0xff]   ;;  %v3872_v59 = vld [vmem:[%s5141_s5 + $0x48] sm:$0xff]  }
 0x194   :  { %v1614_v2 = vadd.f32 %v1613_v60, %v1571_v0  ;;  %3902 = vtanh.f32 %v1612_v62  ;;  %2532 = vmatprep.subr.bf16.mxu0 %v3799_v61  ;;  %v3873_v60 = vld [vmem:[%s5141_s5 + $0x8] sm:$0xff]   ;;  %v3874_v61 = vld [vmem:[%s5141_s5 + $0x40] sm:$0xff]   ;;  %v3876_v0 = vld [vmem:[%s5141_s5 + $0xf8] sm:$0xff]  }
 0x195   :  { %v3875_v62 = vld [vmem:[%s5141_s5] sm:$0xff]  }
 0x196   :  { %3904 = vtanh.f32 %v1614_v2  ;;  %v3878_v2 = vld [vmem:[%s5141_s5 + $0xf0] sm:$0xff]  }
 0x197   :  { %3906 = vtanh.f32 %v1608_v1  ;;  %2533 = vmatpush2.bf16.msra.mxu0 %v3797_v3  ;;  %v3877_v1 = vld [vmem:[%s5141_s5 + $0xb8] sm:$0xff]   ;;  %v3879_v3 = vld [vmem:[%s5141_s5 + $0xb0] sm:$0xff]  }
 0x198   :  { %2534 = vmatprep.subr.bf16.mxu0 %v3805_v5  ;;  %v3880_v5 = vld [vmem:[%s5141_s5 + $0xe8] sm:$0xff]  }
 0x19b   :  { %2535 = vmatpush2.bf16.msra.mxu0 %v3803_v6  ;;  %v3881_v6 = vld [vmem:[%s5141_s5 + $0xa8] sm:$0xff]  }
 0x19c   :  { %3319 = vmatprep.subr.bf16.mxu0 %v3860_v46 }
 0x19e   :  { %2537 = vmatmul.mubr.bf16.vlgmr.msra.gmra.mxu0 %v4822_v63  ;;  %v3815_v63 = vld [vmem:[%s5139_s3 + $0x2c8] ss:$16 sps:$4 sm:$0xff]  }
 0x19f   :  { %v3901_v7 = vpop.eup %3900  ;;  %3320 = vmatpush3.bf16.msra.mxu0 %v3861_v47 }
 0x1a0   :  { %3321 = vmatprep.subr.bf16.mxu0 %v3862_v48 }
 0x1a1   :  { %v3903_v8 = vpop.eup %3902 }
 0x1a3   :  { %v3905_v10 = vpop.eup %3904  ;;  %3322 = vmatpush3.bf16.msra.mxu0 %v3863_v49 }
 0x1a4   :  { %v3907_v12 = vpop.eup %3906  ;;  %v1627_v13 = vpack.c.bf16 %v3905_v10, %v3901_v7  ;;  %3323 = vmatprep.subr.bf16.mxu0 %v3864_v50  ;;  %v3882_v7 = vld [vmem:[%s5141_s5 + $0xe0] sm:$0xff]   ;;  %v3884_v10 = vld [vmem:[%s5141_s5 + $0xd8] sm:$0xff]  }
 0x1a5   :  { %v4927_v16 = vpack.c.bf16 %v3903_v8, %v3907_v12  ;;  %v3883_v8 = vld [vmem:[%s5141_s5 + $0xa0] sm:$0xff]   ;;  %v3885_v12 = vld [vmem:[%s5141_s5 + $0x98] sm:$0xff]  }
 0x1a6   :  { %2493 = vmatprep.mubr.bf16.mxu1 %v1627_v13 }
 0x1a7   :  { %2494 = vmatmul.mubr.bf16.vlgmr.msra.gmra.mxu1 %v4927_v16  ;;  %3324 = vmatpush3.bf16.msra.mxu0 %v3865_v52 }
 0x1a8   :  { %2548 = vmatpush1.bf16.msra.mxu1 %v3812_v15  ;;  %2579 = vmatprep.mubr.bf16.mxu1 %v1627_v13  ;;  %v3886_v13 = vld [vmem:[%s5141_s5 + $0xd0] sm:$0xff]  }
 0x1a9   :  { %2549 = vmatprep.subr.bf16.mxu1 %v3817_v17  ;;  %3325 = vmatprep.subr.bf16.mxu0 %v3866_v53  ;;  %v3887_v15 = vld [vmem:[%s5141_s5 + $0x90] sm:$0xff]   ;;  %v3889_v17 = vld [vmem:[%s5141_s5 + $0x88] sm:$0xff]  }
 0x1ab   :  { %3326 = vmatpush3.bf16.msra.mxu0 %v3867_v54 }
 0x1ac   :  { %2550 = vmatpush1.bf16.msra.mxu1 %v3815_v63  ;;  %3327 = vmatprep.subr.bf16.mxu0 %v3868_v55  ;;  %v3890_v63 = vld [vmem:[%s5141_s5 + $0xc0] sm:$0xff]  }
 0x1ad   :  { %2551 = vmatprep.subr.bf16.mxu1 %v3820_v18  ;;  %v3891_v18 = vld [vmem:[%s5141_s5 + $0x80] sm:$0xff]  }
 0x1af   :  { %3328 = vmatpush3.bf16.msra.mxu0 %v3869_v56 }
 0x1b0   :  { %2552 = vmatpush1.bf16.msra.mxu1 %v3818_v19  ;;  %3329 = vmatprep.subr.bf16.mxu0 %v3870_v57 }
 0x1b1   :  { %2553 = vmatprep.subr.bf16.mxu1 %v3823_v20 }
 0x1b3   :  { %3330 = vmatpush3.bf16.msra.mxu0 %v3871_v58 }
 0x1b4   :  { %2554 = vmatpush1.bf16.msra.mxu1 %v3821_v21  ;;  %3331 = vmatprep.subr.bf16.mxu0 %v3872_v59  ;;  %v1756_v21 = vld [vmem:[%s5142_s4] sm:$0xf] }
 0x1b5   :  { %2555 = vmatprep.subr.bf16.mxu1 %v3826_v22  ;;  %v1765_v22 = vrot.slane %v1756_v21, %v239_v24  ;;  %v1769_v46 = vrot.slane %v1756_v21, %v243_v9 }
 0x1b7   :  { %3332 = vmatpush3.bf16.msra.mxu0 %v3873_v60 }
 0x1b8   :  { %2556 = vmatpush1.bf16.msra.mxu1 %v3824_v11  ;;  %3333 = vmatprep.subr.bf16.mxu0 %v3874_v61 }
 0x1b9   :  { %2557 = vmatprep.subr.bf16.mxu1 %v3829_v51  ;;  %v1761_v51 = vrot.slane %v1756_v21, %v235_v25 }
 0x1bb   :  { %3334 = vmatpush3.bf16.msra.mxu0 %v3875_v62 }
 0x1bc   :  { %2558 = vmatpush1.bf16.msra.mxu1 %v3827_v4 }
 0x1bd   :  { %2559 = vmatprep.subr.bf16.mxu1 %v3832_v27 }
 0x1c0   :  { %2560 = vmatpush1.bf16.msra.mxu1 %v3830_v28 }
 0x1c1   :  { %2561 = vmatprep.subr.bf16.mxu1 %v3835_v29 }
 0x1c4   :  { %2562 = vmatpush1.bf16.msra.mxu1 %v3833_v30 }
 0x1c5   :  { %2563 = vmatprep.subr.bf16.mxu1 %v3838_v31 }
 0x1c8   :  { %2564 = vmatpush2.bf16.msra.mxu1 %v3836_v32 }
 0x1c9   :  { %2565 = vmatprep.subr.bf16.mxu1 %v3841_v33 }
 0x1cc   :  { %2566 = vmatpush2.bf16.msra.mxu1 %v3839_v34 }
 0x1cd   :  { %2567 = vmatprep.subr.bf16.mxu1 %v3844_v35 }
 0x1d0   :  { %2568 = vmatpush2.bf16.msra.mxu1 %v3842_v36 }
 0x1d1   :  { %2569 = vmatprep.subr.bf16.mxu1 %v3847_v37 }
 0x1d4   :  { %2570 = vmatpush2.bf16.msra.mxu1 %v3845_v38 }
 0x1d5   :  { %2571 = vmatprep.subr.bf16.mxu1 %v3850_v39 }
 0x1d8   :  { %2572 = vmatpush2.bf16.msra.mxu1 %v3848_v40 }
 0x1d9   :  { %2573 = vmatprep.subr.bf16.mxu1 %v3853_v41 }
 0x1dc   :  { %2574 = vmatpush2.bf16.msra.mxu1 %v3851_v42 }
 0x1dd   :  { %2575 = vmatprep.subr.bf16.mxu1 %v3856_v43 }
 0x1e0   :  { %2576 = vmatpush2.bf16.msra.mxu1 %v3854_v26 }
 0x1e1   :  { %2577 = vmatprep.subr.bf16.mxu1 %v3859_v44  ;;  %v1773_v44 = vrot.slane %v1756_v21, %v247_v14 }
 0x1e4   :  { %2578 = vmatpush2.bf16.msra.mxu1 %v3857_v45 }
 0x1e5   :  { %3341 = vmatprep.subr.bf16.mxu1 %v3876_v0 }
 0x1e7   :  { %2580 = vmatmul.mubr.bf16.vlgmr.msra.gmra.mxu1 %v4927_v16  ;;  %v3888_v16 = vld [vmem:[%s5141_s5 + $0xc8] sm:$0xff]  }
 0x1e8   :  { %3342 = vmatpush3.bf16.msra.mxu1 %v3877_v1 }
 0x1e9   :  { %3343 = vmatprep.subr.bf16.mxu1 %v3878_v2 }
 0x1ec   :  { %3344 = vmatpush3.bf16.msra.mxu1 %v3879_v3 }
 0x1ed   :  { %3345 = vmatprep.subr.bf16.mxu1 %v3880_v5 }
 0x1f0   :  { %3346 = vmatpush3.bf16.msra.mxu1 %v3881_v6  ;;  %v3286_v6 = vld [vmem:[%s5143_s6] ss:$0 sm:$0xff] }
 0x1f1   :  { %3347 = vmatprep.subr.bf16.mxu1 %v3882_v7 }
 0x1f4   :  { %3348 = vmatpush3.bf16.msra.mxu1 %v3883_v8 }
 0x1f5   :  { %3349 = vmatprep.subr.bf16.mxu1 %v3884_v10 }
 0x1f8   :  { %3350 = vmatpush3.bf16.msra.mxu1 %v3885_v12 }
 0x1f9   :  { %3351 = vmatprep.subr.bf16.mxu1 %v3886_v13 }
 0x1fc   :  { %3352 = vmatpush3.bf16.msra.mxu1 %v3887_v15 }
 0x1fd   :  { %3353 = vmatprep.subr.bf16.mxu1 %v3888_v16 }
 0x200   :  { %3354 = vmatpush3.bf16.msra.mxu1 %v3889_v17 }
 0x201   :  { %3355 = vmatprep.subr.bf16.mxu1 %v3890_v63 }
 0x204   :  { %3356 = vmatpush3.bf16.msra.mxu1 %v3891_v18 }
 0x21e   :  { %v2452_v19 = vpop.f32.mrf.mxu0 }
 0x21f   :  { %v2453_v32 = vadd.f32 %v2452_v19, %v1761_v51 }
 0x220   :  { %v2454_v20 = vpop.f32.mrf.mxu0 }
 0x221   :  { %v2455_v27 = vadd.f32 %v2454_v20, %v1765_v22 }
 0x222   :  { %v2456_v11 = vpop.f32.mrf.mxu0 }
 0x223   :  { %v2457_v30 = vadd.f32 %v2456_v11, %v1761_v51 }
 0x224   :  { %v2458_v28 = vpop.f32.mrf.mxu0 }
 0x225   :  { %v2459_v34 = vadd.f32 %v2458_v28, %v1765_v22 }
 0x25e   :  { %v2538_v43 = vpop.f32.mrf.mxu0 }
 0x25f   :  { %v2539_v54 = vadd.f32 %v2538_v43, %v1769_v46 }
 0x260   :  { %v2540_v26 = vpop.f32.mrf.mxu0 }
 0x261   :  { %v2541_v48 = vadd.f32 %v2540_v26, %v1773_v44 }
 0x262   :  { %v2542_v45 = vpop.f32.mrf.mxu0 }
 0x263   :  { %v2543_v52 = vadd.f32 %v2542_v45, %v1769_v46 }
 0x264   :  { %v2544_v49 = vpop.f32.mrf.mxu0 }
 0x265   :  { %v2545_v56 = vadd.f32 %v2544_v49, %v1773_v44 }
 0x267   :  { %v2495_v4 = vpop.f32.mrf.mxu1 }
 0x268   :  { %v2496_v36 = vadd.f32 %v2495_v4, %v2453_v32 }
 0x269   :  { %v2497_v29 = vpop.f32.mrf.mxu1 }
 0x26a   :  { %v2498_v31 = vadd.f32 %v2497_v29, %v2455_v27 }
 0x26b   :  { %v2499_v33 = vpop.f32.mrf.mxu1 }
 0x26c   :  { %v2500_v35 = vadd.f32 %v2499_v33, %v2457_v30  ;;  %3908 = vtanh.f32 %v2498_v31 }
 0x26d   :  { %v2501_v37 = vpop.f32.mrf.mxu1 }
 0x26e   :  { %v2502_v38 = vadd.f32 %v2501_v37, %v2459_v34  ;;  %3910 = vtanh.f32 %v2500_v35 }
 0x270   :  { %3912 = vtanh.f32 %v2502_v38 }
 0x271   :  { %3914 = vtanh.f32 %v2496_v36 }
 0x279   :  { %v3909_v24 = vpop.eup %3908 }
 0x27b   :  { %v3911_v39 = vpop.eup %3910 }
 0x27d   :  { %v3913_v25 = vpop.eup %3912 }
 0x27e   :  { %v3915_v40 = vpop.eup %3914  ;;  %v2599_v41 = vpack.c.bf16 %v3913_v25, %v3909_v24 }
 0x27f   :  { %v2598_v42 = vpack.c.bf16 %v3911_v39, %v3915_v40 }
 0x280   :  { %2897 = vmatprep.mubr.bf16.mxu0 %v2599_v41 }
 0x281   :  { %2898 = vmatmul.mubr.bf16.vlgmr.msra.gmra.mxu0 %v2598_v42 }
 0x2a7   :  { %v2581_v47 = vpop.f32.mrf.mxu1 }
 0x2a8   :  { %v2582_v58 = vadd.f32 %v2581_v47, %v2539_v54 }
 0x2a9   :  { %v2583_v50 = vpop.f32.mrf.mxu1 }
 0x2aa   :  { %v2584_v53 = vadd.f32 %v2583_v50, %v2541_v48 }
 0x2ab   :  { %v2585_v55 = vpop.f32.mrf.mxu1 }
 0x2ac   :  { %v2586_v57 = vadd.f32 %v2585_v55, %v2543_v52  ;;  %3916 = vtanh.f32 %v2584_v53 }
 0x2ad   :  { %v2587_v59 = vpop.f32.mrf.mxu1 }
 0x2ae   :  { %v2588_v60 = vadd.f32 %v2587_v59, %v2545_v56  ;;  %3918 = vtanh.f32 %v2586_v57 }
 0x2b0   :  { %3920 = vtanh.f32 %v2588_v60 }
 0x2b1   :  { %3922 = vtanh.f32 %v2582_v58 }
 0x2b9   :  { %v3917_v14 = vpop.eup %3916 }
 0x2bb   :  { %v3919_v23 = vpop.eup %3918 }
 0x2bd   :  { %v3921_v9 = vpop.eup %3920 }
 0x2be   :  { %v3923_v61 = vpop.eup %3922  ;;  %v2601_v62 = vpack.c.bf16 %v3921_v9, %v3917_v14 }
 0x2bf   :  { %v2600_v0 = vpack.c.bf16 %v3919_v23, %v3923_v61 }
 0x2c0   :  { %2938 = vmatprep.mubr.bf16.mxu1 %v2601_v62 }
 0x2c1   :  { %2939 = vmatmul.mubr.bf16.vlgmr.msra.gmra.mxu1 %v2600_v0 }
 0x341   :  { %v3335_v1 = vpop.f32.mrf.mxu0 }
 0x343   :  { %v3336_v2 = vpop.f32.mrf.mxu0 }
 0x344   :  { %v3337_v5 = vadd.f32 %v3336_v2, %v3335_v1 }
 0x345   :  { %v3338_v3 = vpop.f32.mrf.mxu0 }
 0x346   :  { %v2900_v12 = vadd.f32 %v3337_v5, %v3286_v6 }
 0x347   :  { %v3339_v7 = vpop.f32.mrf.mxu0 }
 0x348   :  { %v3340_v13 = vadd.f32 %v3339_v7, %v3338_v3 }
 0x34a   :  { %v2903_v18 = vadd.f32 %v3340_v13, %v3286_v6 }
 0x381   :  { %v3357_v8 = vpop.f32.mrf.mxu1 }
 0x383   :  { %v3358_v10 = vpop.f32.mrf.mxu1 }
 0x384   :  { %v3359_v15 = vadd.f32 %v3358_v10, %v3357_v8 }
 0x385   :  { %v3360_v16 = vpop.f32.mrf.mxu1 }
 0x386   :  { %v2941_v17 = vadd.f32 %v3359_v15, %v2900_v12 }
 0x387   :  { %v3361_v63 = vpop.f32.mrf.mxu1 }
 0x388   :  { %2947 = vst [vmem:[%s5144_s7] sm:$0xff] %v2941_v17  ;;  %v3362_v19 = vadd.f32 %v3361_v63, %v3360_v16 }
 0x38a   :  { %v2944_v20 = vadd.f32 %v3362_v19, %v2903_v18 }
 0x38c   :  { %2948 = vst [vmem:[%s5144_s7 + $0x8] sm:$0xff] %v2944_v20 }

</bundles_post_ra>
